<compile_context>
chip_gen: v7x
topology: tpu7x:2x2x1
jax: 0.10.0
libtpu: 0.0.40
codegen_flags: <defaults>
</compile_context>

<pallas_src>
import functools

import jax
import jax.numpy as jnp
from jax.experimental import pallas as pl
from jax.experimental.pallas import tpu as pltpu


# ---------------------------------------------------------------------------
# Kernel body
# ---------------------------------------------------------------------------
def ffn_kernel(x_ref, w1_ref, b1_ref, w2_ref, b2_ref, o_ref):
    # x_ref:  (tm, C) f32 activation tile
    # w1_ref: (C, 4C) bf16 resident, b1_ref: (1, 4C) f32
    # w2_ref: (4C, C) bf16 resident, b2_ref: (1, C) f32
    x = x_ref[...].astype(jnp.bfloat16)                       # cheap VPU cast
    h = jnp.dot(x, w1_ref[...], preferred_element_type=jnp.float32)   # MXU, f32 acc
    h = jnp.maximum(h + b1_ref[...], 0.0)                      # f32 bias + ReLU (VPU)
    h = h.astype(jnp.bfloat16)
    y = jnp.dot(h, w2_ref[...], preferred_element_type=jnp.float32)   # MXU, f32 acc
    o_ref[...] = (y + b2_ref[...]).astype(o_ref.dtype)


# ---------------------------------------------------------------------------
# Helpers
# ---------------------------------------------------------------------------
def _round_up(n, m):
    return ((n + m - 1) // m) * m


_MIN_SPLIT_ROWS = 256       # don't split below 256-row tiles (v7x megacore floor)
_VMEM_LIMIT = None


def _vmem_limit_bytes():
    """Generation-aware scoped-VMEM request (cached)."""
    global _VMEM_LIMIT
    if _VMEM_LIMIT is None:
        phys = None
        try:
            phys = getattr(pltpu.get_tpu_info(), "vmem_capacity_bytes", None)
        except Exception:
            phys = None
        if phys is not None and phys >= 100 * 1024 * 1024:
            _VMEM_LIMIT = 64 * 1024 * 1024      # v5e/v6e: 128 MiB physical VMEM
        else:
            _VMEM_LIMIT = 40 * 1024 * 1024      # v7x (64 MiB physical) / unknown
    return _VMEM_LIMIT


def _choose_row_tile(M, tm_max):
    """Pick the M-row tile: exact for small M, >=2 near-even tiles for large M."""
    tm_max = max(8, (tm_max // 8) * 8)
    m8 = _round_up(M, 8)
    if m8 < 2 * _MIN_SPLIT_ROWS:
        return min(m8, tm_max)                  # single (or few) exact-ish tiles
    ntiles = max(2, pl.cdiv(m8, tm_max))        # >=2 tiles -> both v7x TCs busy
    return min(tm_max, _round_up(pl.cdiv(m8, ntiles), 8))


# ---------------------------------------------------------------------------
# pallas_call wrapper
# ---------------------------------------------------------------------------
@functools.partial(jax.jit, static_argnames=("tm",))
def _ffn_call(x2, w1, b1, w2, b2, *, tm):
    M, C = x2.shape
    H = w1.shape[1]

    # bf16 weights: half the resident VMEM and half the weight DMA bytes.
    w1b = w1.astype(jnp.bfloat16)
    w2b = w2.astype(jnp.bfloat16)

    grid_m = pl.cdiv(M, tm)                     # ragged last tile masked by Pallas

    in_specs = [
        pl.BlockSpec((tm, C), lambda i: (i, 0)),   # x tile (double-buffered)
        pl.BlockSpec((C, H), lambda i: (0, 0)),    # W1 (grid-invariant, resident)
        pl.BlockSpec((1, H), lambda i: (0, 0)),    # b1
        pl.BlockSpec((H, C), lambda i: (0, 0)),    # W2 (grid-invariant, resident)
        pl.BlockSpec((1, C), lambda i: (0, 0)),    # b2
    ]
    out_spec = pl.BlockSpec((tm, C), lambda i: (i, 0))

    flops = 4 * M * C * H                       # two (M,C,H)/(M,H,C) matmuls
    bytes_accessed = (2 * M * C) * 4 + (C * H + H * C) * 2 + (H + C) * 4

    return pl.pallas_call(
        ffn_kernel,
        out_shape=jax.ShapeDtypeStruct((M, C), x2.dtype),
        grid_spec=pltpu.PrefetchScalarGridSpec(
            num_scalar_prefetch=0,
            grid=(grid_m,),
            in_specs=in_specs,
            out_specs=out_spec,
        ),
        compiler_params=pltpu.CompilerParams(
            dimension_semantics=("parallel",),      # M tiles shard across TCs on v7x
            vmem_limit_bytes=_vmem_limit_bytes(),
        ),
        cost_estimate=pl.CostEstimate(
            flops=flops, transcendentals=0, bytes_accessed=bytes_accessed
        ),
    )(x2, w1b, b1, w2b, b2)


def feed_forward(x, w1, b1, w2, b2, *, tm=512):
    """x: (B, T, C) -> (B, T, C).  Dropout is eval-mode (identity)."""
    B, T, C = x.shape
    M = B * T
    tm_eff = _choose_row_tile(M, tm)
    out2 = _ffn_call(x.reshape(M, C), w1, b1, w2, b2, tm=tm_eff)
    return out2.reshape(B, T, C)


# ---------------------------------------------------------------------------
# Params / reference
# ---------------------------------------------------------------------------
def init_params(key, n_embed):
    """Deterministic init mimicking nn.Linear's uniform(-1/sqrt(in), 1/sqrt(in))."""
    h = 4 * n_embed
    k1, k2, k3, k4 = jax.random.split(key, 4)
    lim1 = 1.0 / jnp.sqrt(n_embed)
    lim2 = 1.0 / jnp.sqrt(h)
    w1 = jax.random.uniform(k1, (n_embed, h), jnp.float32, -lim1, lim1)
    b1 = jax.random.uniform(k2, (1, h), jnp.float32, -lim1, lim1)
    w2 = jax.random.uniform(k3, (h, n_embed), jnp.float32, -lim2, lim2)
    b2 = jax.random.uniform(k4, (1, n_embed), jnp.float32, -lim2, lim2)
    return w1, b1, w2, b2


def _reference(x, w1, b1, w2, b2):
    """Same math with matched bf16 operands / f32 accumulation (plain XLA)."""
    B, T, C = x.shape
    xb = x.reshape(-1, C).astype(jnp.bfloat16)
    h = jnp.dot(xb, w1.astype(jnp.bfloat16), preferred_element_type=jnp.float32) + b1
    h = jnp.maximum(h, 0.0)
    y = jnp.dot(h.astype(jnp.bfloat16), w2.astype(jnp.bfloat16),
                preferred_element_type=jnp.float32) + b2
    return y.reshape(B, T, C)


# ---------------------------------------------------------------------------
# Self-test
# ---------------------------------------------------------------------------
if __name__ == "__main__":
    n_embed = 384
    key = jax.random.PRNGKey(0)
    kp, kx1, kx2, kx3 = jax.random.split(key, 4)
    w1, b1, w2, b2 = init_params(kp, n_embed)

    cases = [
        (kx1, (2, 8)),     # M = 16   -> single exact tile
        (kx2, (4, 100)),   # M = 400  -> single exact tile, no padding copy
        (kx3, (2, 640)),   # M = 1280 -> 3 row tiles, ragged last tile masked
    ]
    for kx, (B, T) in cases:
        x = jax.random.normal(kx, (B, T, n_embed), jnp.float32)
        out = jax.block_until_ready(feed_forward(x, w1, b1, w2, b2))
        ref = _reference(x, w1, b1, w2, b2)
        assert out.shape == (B, T, n_embed)
        # Kernel uses bf16 matmul operands with f32 accumulation (matches `ref`);
        # drift vs. an exact f32 torch reference is ~1e-2-level and documented.
        assert jnp.allclose(out, ref, atol=2e-3, rtol=2e-3), float(
            jnp.max(jnp.abs(out - ref))
        )

    print("KERNEL_OK")
</pallas_src>

<mosaic_0001>
module attributes {stable_mosaic.version = 11 : i64} {
  func.func @ffn_kernel(%arg0: i32, %arg1: memref<16x384xf32, #tpu.memory_space<vmem>>, %arg2: memref<384x1536xbf16, #tpu.memory_space<vmem>>, %arg3: memref<1x1536xf32, #tpu.memory_space<vmem>>, %arg4: memref<1536x384xbf16, #tpu.memory_space<vmem>>, %arg5: memref<1x384xf32, #tpu.memory_space<vmem>>, %arg6: memref<16x384xf32, #tpu.memory_space<vmem>>) attributes {dimension_semantics = [#tpu.dimension_semantics<parallel>], iteration_bounds = array<i64: 1>, scalar_prefetch = 0 : i64, scratch_operands = 0 : i64, tpu.core_type = #tpu.core_type<tc>, window_params = [{transform_indices = @transform_0, window_bounds = array<i64: 16, 384>}, {pipeline_mode = #tpu.pipeline_mode<synchronous>, transform_indices = @transform_1, window_bounds = array<i64: 384, 1536>}, {pipeline_mode = #tpu.pipeline_mode<synchronous>, transform_indices = @transform_2, window_bounds = array<i64: 1, 1536>}, {pipeline_mode = #tpu.pipeline_mode<synchronous>, transform_indices = @transform_3, window_bounds = array<i64: 1536, 384>}, {pipeline_mode = #tpu.pipeline_mode<synchronous>, transform_indices = @transform_4, window_bounds = array<i64: 1, 384>}, {transform_indices = @transform_5, window_bounds = array<i64: 16, 384>}]} {
    %c0 = arith.constant 0 : index
    %c0_0 = arith.constant 0 : index
    %0 = vector.load %arg1[%c0, %c0_0] : memref<16x384xf32, #tpu.memory_space<vmem>>, vector<16x384xf32>
    %1 = arith.truncf %0 : vector<16x384xf32> to vector<16x384xbf16>
    %c0_1 = arith.constant 0 : index
    %c0_2 = arith.constant 0 : index
    %2 = vector.load %arg2[%c0_1, %c0_2] : memref<384x1536xbf16, #tpu.memory_space<vmem>>, vector<384x1536xbf16>
    %cst = arith.constant dense<0.000000e+00> : vector<16x1536xf32>
    %3 = tpu.matmul %1, %2, %cst {dimension_numbers = #tpu.dot_dimension_numbers<[1], [0], [0], [1], [0, 0, 1, 1], [], []>} : vector<16x384xbf16>, vector<384x1536xbf16>, vector<16x1536xf32> -> vector<16x1536xf32>
    %c0_3 = arith.constant 0 : index
    %c0_4 = arith.constant 0 : index
    %4 = vector.load %arg3[%c0_3, %c0_4] : memref<1x1536xf32, #tpu.memory_space<vmem>>, vector<1x1536xf32>
    %5 = vector.broadcast %4 : vector<1x1536xf32> to vector<16x1536xf32>
    %6 = arith.addf %3, %5 : vector<16x1536xf32>
    %cst_5 = arith.constant 0.000000e+00 : f32
    %7 = vector.broadcast %cst_5 : f32 to vector<16x1536xf32>
    %8 = arith.maximumf %6, %7 : vector<16x1536xf32>
    %9 = arith.truncf %8 : vector<16x1536xf32> to vector<16x1536xbf16>
    %c0_6 = arith.constant 0 : index
    %c0_7 = arith.constant 0 : index
    %10 = vector.load %arg4[%c0_6, %c0_7] : memref<1536x384xbf16, #tpu.memory_space<vmem>>, vector<1536x384xbf16>
    %cst_8 = arith.constant dense<0.000000e+00> : vector<16x384xf32>
    %11 = tpu.matmul %9, %10, %cst_8 {dimension_numbers = #tpu.dot_dimension_numbers<[1], [0], [0], [1], [0, 0, 1, 1], [], []>} : vector<16x1536xbf16>, vector<1536x384xbf16>, vector<16x384xf32> -> vector<16x384xf32>
    %c0_9 = arith.constant 0 : index
    %c0_10 = arith.constant 0 : index
    %12 = vector.load %arg5[%c0_9, %c0_10] : memref<1x384xf32, #tpu.memory_space<vmem>>, vector<1x384xf32>
    %13 = vector.broadcast %12 : vector<1x384xf32> to vector<16x384xf32>
    %14 = arith.addf %11, %13 : vector<16x384xf32>
    %c0_11 = arith.constant 0 : index
    %c0_12 = arith.constant 0 : index
    %15 = vector.load %arg6[%c0_11, %c0_12] : memref<16x384xf32, #tpu.memory_space<vmem>>, vector<16x384xf32>
    tpu.vector_store %arg6[%c0_11, %c0_12], %14 {strides = array<i32>} : memref<16x384xf32, #tpu.memory_space<vmem>>, vector<16x384xf32>,
    return
  }
  func.func @transform_0(%arg0: i32) -> (i32, i32) {
    %c0_i32 = arith.constant 0 : i32
    %c0_i32_0 = arith.constant 0 : i32
    return %arg0, %c0_i32 : i32, i32
  }
  func.func @transform_1(%arg0: i32) -> (i32, i32) {
    %c0_i32 = arith.constant 0 : i32
    %c0_i32_0 = arith.constant 0 : i32
    %c0_i32_1 = arith.constant 0 : i32
    return %c0_i32, %c0_i32_0 : i32, i32
  }
  func.func @transform_2(%arg0: i32) -> (i32, i32) {
    %c0_i32 = arith.constant 0 : i32
    %c0_i32_0 = arith.constant 0 : i32
    %c0_i32_1 = arith.constant 0 : i32
    return %c0_i32, %c0_i32_0 : i32, i32
  }
  func.func @transform_3(%arg0: i32) -> (i32, i32) {
    %c0_i32 = arith.constant 0 : i32
    %c0_i32_0 = arith.constant 0 : i32
    %c0_i32_1 = arith.constant 0 : i32
    return %c0_i32, %c0_i32_0 : i32, i32
  }
  func.func @transform_4(%arg0: i32) -> (i32, i32) {
    %c0_i32 = arith.constant 0 : i32
    %c0_i32_0 = arith.constant 0 : i32
    %c0_i32_1 = arith.constant 0 : i32
    return %c0_i32, %c0_i32_0 : i32, i32
  }
  func.func @transform_5(%arg0: i32) -> (i32, i32) {
    %c0_i32 = arith.constant 0 : i32
    %c0_i32_0 = arith.constant 0 : i32
    return %arg0, %c0_i32 : i32, i32
  }
}

</mosaic_0001>

<bundles_post_ra>
// kernel: _ffn_call.1
= control target key start
LH: loop header
LB: loop body
LE: loop exit
PB: predicated region body
PF: predicated region fallthrough
CT: control target
= control target key end

     0   :  { %s8376_s0 = inlined_call_operand.vmem [shape: f32[16,384], index: 0, kind: input, shape index: {}]   ;;  %s8377_s1 = inlined_call_operand.vmem [shape: bf16[384,1536], index: 1, kind: input, shape index: {}]   ;;  %s8378_s2 = inlined_call_operand.vmem [shape: f32[1,1536], index: 2, kind: input, shape index: {}]   ;;  %s8379_s3 = inlined_call_operand.vmem [shape: bf16[1536,384], index: 3, kind: input, shape index: {}]   ;;  %s8380_s4 = inlined_call_operand.vmem [shape: f32[1,384], index: 4, kind: input, shape index: {}]   ;;  %s8381_s5 = inlined_call_operand.hbm [shape: f32[16,384], index: 5, kind: output, shape index: {}]  }
   0x1   :  { %v5622_v0 = vld [vmem:[%s8377_s1 + $0x4] ss:$48 sps:$4 sm:$0xff]   ;;  %v5624_v1 = vld [vmem:[%s8377_s1] ss:$48 sps:$4 sm:$0xff]   ;;  %v23_v18 = vld [vmem:[%s8376_s0 + $0x8] sm:$0xff] }
   0x2   :  { %1823 = vmatprep.subr.bf16.mxu1 %v5622_v0  ;;  %v5625_v2 = vld [vmem:[%s8377_s1 + $0x64] ss:$48 sps:$4 sm:$0xff]   ;;  %v5627_v3 = vld [vmem:[%s8377_s1 + $0x60] ss:$48 sps:$4 sm:$0xff]   ;;  %v25_v58 = vld [vmem:[%s8376_s0 + $0x18] sm:$0xff] }
   0x3   :  { %1824 = vmatpush1.bf16.msra.mxu1 %v5624_v1  ;;  %v5628_v4 = vld [vmem:[%s8377_s1 + $0xc4] ss:$48 sps:$4 sm:$0xff]   ;;  %v5630_v5 = vld [vmem:[%s8377_s1 + $0xc0] ss:$48 sps:$4 sm:$0xff]  }
   0x4   :  { %1825 = vmatprep.subr.bf16.mxu1 %v5625_v2  ;;  %v5631_v6 = vld [vmem:[%s8377_s1 + $0x124] ss:$48 sps:$4 sm:$0xff]   ;;  %v5633_v7 = vld [vmem:[%s8377_s1 + $0x120] ss:$48 sps:$4 sm:$0xff]  }
   0x5   :  { %v5634_v8 = vld [vmem:[%s8377_s1 + $0x184] ss:$48 sps:$4 sm:$0xff]   ;;  %v5636_v9 = vld [vmem:[%s8377_s1 + $0x180] ss:$48 sps:$4 sm:$0xff]  }
   0x6   :  { %v5637_v10 = vld [vmem:[%s8377_s1 + $0x1e4] ss:$48 sps:$4 sm:$0xff]   ;;  %v5639_v11 = vld [vmem:[%s8377_s1 + $0x1e0] ss:$48 sps:$4 sm:$0xff]  }
   0x7   :  { %1826 = vmatpush1.bf16.msra.mxu1 %v5627_v3  ;;  %v5640_v12 = vld [vmem:[%s8377_s1 + $0x244] ss:$48 sps:$4 sm:$0xff]   ;;  %v5642_v14 = vld [vmem:[%s8377_s1 + $0x240] ss:$48 sps:$4 sm:$0xff]   ;;  %v6463_v3 = vmov 0  }
   0x8   :  { %1827 = vmatprep.subr.bf16.mxu1 %v5628_v4  ;;  %v5667_v13 = vld [vmem:[%s8377_s1 + $0x14] ss:$48 sps:$4 sm:$0xff]   ;;  %v5671_v16 = vld [vmem:[%s8377_s1 + $0x10] ss:$48 sps:$4 sm:$0xff]  }
   0x9   :  { %v5643_v15 = vld [vmem:[%s8377_s1 + $0x2a4] ss:$48 sps:$4 sm:$0xff]   ;;  %1995 = vmatprep.subr.bf16.mxu0 %v5667_v13  ;;  %v5678_v21 = vld [vmem:[%s8377_s1 + $0x70] ss:$48 sps:$4 sm:$0xff]  }
   0xa   :  { %v5673_v17 = vld [vmem:[%s8377_s1 + $0x74] ss:$48 sps:$4 sm:$0xff]   ;;  %1996 = vmatpush1.bf16.msra.mxu0 %v5671_v16  ;;  %v5645_v22 = vld [vmem:[%s8377_s1 + $0x2a0] ss:$48 sps:$4 sm:$0xff]  }
   0xb   :  { %1828 = vmatpush1.bf16.msra.mxu1 %v5630_v5  ;;  %v26_v19 = vld [vmem:[%s8376_s0 + $0x20] sm:$0xff]  ;;  %1997 = vmatprep.subr.bf16.mxu0 %v5673_v17 }
   0xc   :  { %1829 = vmatprep.subr.bf16.mxu1 %v5631_v6  ;;  %v6557_v20 = vpack.c.bf16 %v26_v19, %v23_v18  ;;  %v5679_v23 = vld [vmem:[%s8377_s1 + $0xd4] ss:$48 sps:$4 sm:$0xff]   ;;  %v5684_v25 = vld [vmem:[%s8377_s1 + $0xd0] ss:$48 sps:$4 sm:$0xff]  }
   0xd   :  { %v5646_v24 = vld [vmem:[%s8377_s1 + $0x304] ss:$48 sps:$4 sm:$0xff]   ;;  %v5648_v27 = vld [vmem:[%s8377_s1 + $0x300] ss:$48 sps:$4 sm:$0xff]  }
   0xe   :  { %1855 = vmatprep.mubr.bf16.mxu1 %v6557_v20  ;;  %1998 = vmatpush1.bf16.msra.mxu0 %v5678_v21  ;;  %v5685_v26 = vld [vmem:[%s8377_s1 + $0x134] ss:$48 sps:$4 sm:$0xff]   ;;  %v5690_v29 = vld [vmem:[%s8377_s1 + $0x130] ss:$48 sps:$4 sm:$0xff]  }
   0xf   :  { %1830 = vmatpush1.bf16.msra.mxu1 %v5633_v7  ;;  %1999 = vmatprep.subr.bf16.mxu0 %v5679_v23  ;;  %v5649_v28 = vld [vmem:[%s8377_s1 + $0x364] ss:$48 sps:$4 sm:$0xff]   ;;  %v5651_v31 = vld [vmem:[%s8377_s1 + $0x360] ss:$48 sps:$4 sm:$0xff]  }
  0x10   :  { %1831 = vmatprep.subr.bf16.mxu1 %v5634_v8  ;;  %2027 = vmatprep.mubr.bf16.mxu0 %v6557_v20  ;;  %v5691_v30 = vld [vmem:[%s8377_s1 + $0x194] ss:$48 sps:$4 sm:$0xff]   ;;  %v5696_v33 = vld [vmem:[%s8377_s1 + $0x190] ss:$48 sps:$4 sm:$0xff]  }
  0x11   :  { %v5652_v32 = vld [vmem:[%s8377_s1 + $0x3c4] ss:$48 sps:$4 sm:$0xff]   ;;  %v5654_v35 = vld [vmem:[%s8377_s1 + $0x3c0] ss:$48 sps:$4 sm:$0xff]  }
  0x12   :  { %2000 = vmatpush1.bf16.msra.mxu0 %v5684_v25  ;;  %v5697_v34 = vld [vmem:[%s8377_s1 + $0x1f4] ss:$48 sps:$4 sm:$0xff]   ;;  %v5702_v37 = vld [vmem:[%s8377_s1 + $0x1f0] ss:$48 sps:$4 sm:$0xff]  }
  0x13   :  { %1832 = vmatpush1.bf16.msra.mxu1 %v5636_v9  ;;  %2001 = vmatprep.subr.bf16.mxu0 %v5685_v26  ;;  %v5655_v36 = vld [vmem:[%s8377_s1 + $0x424] ss:$48 sps:$4 sm:$0xff]   ;;  %v5657_v39 = vld [vmem:[%s8377_s1 + $0x420] ss:$48 sps:$4 sm:$0xff]  }
  0x14   :  { %1833 = vmatprep.subr.bf16.mxu1 %v5637_v10  ;;  %v5703_v38 = vld [vmem:[%s8377_s1 + $0x254] ss:$48 sps:$4 sm:$0xff]   ;;  %v5708_v41 = vld [vmem:[%s8377_s1 + $0x250] ss:$48 sps:$4 sm:$0xff]  }
  0x15   :  { %v5658_v40 = vld [vmem:[%s8377_s1 + $0x484] ss:$48 sps:$4 sm:$0xff]   ;;  %v5660_v43 = vld [vmem:[%s8377_s1 + $0x480] ss:$48 sps:$4 sm:$0xff]  }
  0x16   :  { %2002 = vmatpush1.bf16.msra.mxu0 %v5690_v29  ;;  %v5709_v42 = vld [vmem:[%s8377_s1 + $0x2b4] ss:$48 sps:$4 sm:$0xff]   ;;  %v5714_v45 = vld [vmem:[%s8377_s1 + $0x2b0] ss:$48 sps:$4 sm:$0xff]  }
  0x17   :  { %1834 = vmatpush1.bf16.msra.mxu1 %v5639_v11  ;;  %2003 = vmatprep.subr.bf16.mxu0 %v5691_v30  ;;  %v5661_v44 = vld [vmem:[%s8377_s1 + $0x4e4] ss:$48 sps:$4 sm:$0xff]   ;;  %v5663_v47 = vld [vmem:[%s8377_s1 + $0x4e0] ss:$48 sps:$4 sm:$0xff]   ;;  %v27_v30 = vld [vmem:[%s8376_s0 + $0x28] sm:$0xff] }
  0x18   :  { %1835 = vmatprep.subr.bf16.mxu1 %v5640_v12  ;;  %v5715_v46 = vld [vmem:[%s8377_s1 + $0x314] ss:$48 sps:$4 sm:$0xff]   ;;  %v5720_v49 = vld [vmem:[%s8377_s1 + $0x310] ss:$48 sps:$4 sm:$0xff]  }
  0x19   :  { %v5664_v48 = vld [vmem:[%s8377_s1 + $0x544] ss:$48 sps:$4 sm:$0xff]   ;;  %v5666_v51 = vld [vmem:[%s8377_s1 + $0x540] ss:$48 sps:$4 sm:$0xff]  }
  0x1a   :  { %2004 = vmatpush1.bf16.msra.mxu0 %v5696_v33  ;;  %v5721_v50 = vld [vmem:[%s8377_s1 + $0x374] ss:$48 sps:$4 sm:$0xff]   ;;  %v5726_v53 = vld [vmem:[%s8377_s1 + $0x370] ss:$48 sps:$4 sm:$0xff]  }
  0x1b   :  { %1836 = vmatpush1.bf16.msra.mxu1 %v5642_v14  ;;  %2005 = vmatprep.subr.bf16.mxu0 %v5697_v34  ;;  %v5669_v52 = vld [vmem:[%s8377_s1 + $0x5a4] ss:$48 sps:$4 sm:$0xff]   ;;  %v5672_v54 = vld [vmem:[%s8377_s1 + $0x5a0] ss:$48 sps:$4 sm:$0xff]  }
  0x1c   :  { %1837 = vmatprep.subr.bf16.mxu1 %v5643_v15  ;;  %v5727_v55 = vld [vmem:[%s8377_s1 + $0x3d4] ss:$48 sps:$4 sm:$0xff]   ;;  %v5732_v59 = vld [vmem:[%s8377_s1 + $0x3d0] ss:$48 sps:$4 sm:$0xff]  }
  0x1d   :  { %v5677_v56 = vld [vmem:[%s8377_s1 + $0x604] ss:$48 sps:$4 sm:$0xff]   ;;  %v5675_v62 = vld [vmem:[%s8377_s1 + $0x600] ss:$48 sps:$4 sm:$0xff]  }
  0x1e   :  { %2006 = vmatpush1.bf16.msra.mxu0 %v5702_v37  ;;  %v22_v57 = vld [vmem:[%s8376_s0] sm:$0xff]  ;;  %v24_v29 = vld [vmem:[%s8376_s0 + $0x10] sm:$0xff] }
  0x1f   :  { %1838 = vmatpush1.bf16.msra.mxu1 %v5645_v22  ;;  %2007 = vmatprep.subr.bf16.mxu0 %v5703_v38  ;;  %v5733_v60 = vld [vmem:[%s8377_s1 + $0x434] ss:$48 sps:$4 sm:$0xff]   ;;  %v6681_v61 = vpack.c.bf16 %v25_v58, %v22_v57  ;;  %v5738_v0 = vld [vmem:[%s8377_s1 + $0x430] ss:$48 sps:$4 sm:$0xff]   ;;  %v6789_v34 = vpack.c.bf16 %v27_v30, %v24_v29  ;;  %v5808_v30 = vld [vmem:[%s8377_s1 + $0x548] ss:$48 sps:$4 sm:$0xff]  }
  0x20   :  { %1839 = vmatprep.subr.bf16.mxu1 %v5646_v24  ;;  %v5683_v63 = vld [vmem:[%s8377_s1 + $0x664] ss:$48 sps:$4 sm:$0xff]   ;;  %v5681_v2 = vld [vmem:[%s8377_s1 + $0x660] ss:$48 sps:$4 sm:$0xff]  }
  0x21   :  { %v5739_v1 = vld [vmem:[%s8377_s1 + $0x494] ss:$48 sps:$4 sm:$0xff]   ;;  %v5744_v5 = vld [vmem:[%s8377_s1 + $0x490] ss:$48 sps:$4 sm:$0xff]  }
  0x22   :  { %2008 = vmatpush1.bf16.msra.mxu0 %v5708_v41  ;;  %v5689_v4 = vld [vmem:[%s8377_s1 + $0x6c4] ss:$48 sps:$4 sm:$0xff]   ;;  %v5687_v7 = vld [vmem:[%s8377_s1 + $0x6c0] ss:$48 sps:$4 sm:$0xff]  }
  0x23   :  { %1840 = vmatpush1.bf16.msra.mxu1 %v5648_v27  ;;  %2009 = vmatprep.subr.bf16.mxu0 %v5709_v42  ;;  %v5745_v6 = vld [vmem:[%s8377_s1 + $0x4f4] ss:$48 sps:$4 sm:$0xff]   ;;  %v5750_v9 = vld [vmem:[%s8377_s1 + $0x4f0] ss:$48 sps:$4 sm:$0xff]  }
  0x24   :  { %1841 = vmatprep.subr.bf16.mxu1 %v5649_v28  ;;  %v5695_v8 = vld [vmem:[%s8377_s1 + $0x724] ss:$48 sps:$4 sm:$0xff]   ;;  %v5693_v11 = vld [vmem:[%s8377_s1 + $0x720] ss:$48 sps:$4 sm:$0xff]  }
  0x25   :  { %v5751_v10 = vld [vmem:[%s8377_s1 + $0x554] ss:$48 sps:$4 sm:$0xff]   ;;  %v5756_v13 = vld [vmem:[%s8377_s1 + $0x550] ss:$48 sps:$4 sm:$0xff]  }
  0x26   :  { %2010 = vmatpush1.bf16.msra.mxu0 %v5714_v45  ;;  %v5701_v12 = vld [vmem:[%s8377_s1 + $0x784] ss:$48 sps:$4 sm:$0xff]   ;;  %v5699_v15 = vld [vmem:[%s8377_s1 + $0x780] ss:$48 sps:$4 sm:$0xff]  }
  0x27   :  { %1842 = vmatpush1.bf16.msra.mxu1 %v5651_v31  ;;  %2011 = vmatprep.subr.bf16.mxu0 %v5715_v46  ;;  %v5757_v14 = vld [vmem:[%s8377_s1 + $0x5b4] ss:$48 sps:$4 sm:$0xff]   ;;  %v5762_v17 = vld [vmem:[%s8377_s1 + $0x5b0] ss:$48 sps:$4 sm:$0xff]   ;;  %v5725_v31 = vld [vmem:[%s8377_s1 + $0xc] ss:$48 sps:$4 sm:$0xff]  }
  0x28   :  { %1843 = vmatprep.subr.bf16.mxu1 %v5652_v32  ;;  %v5707_v16 = vld [vmem:[%s8377_s1 + $0x7e4] ss:$48 sps:$4 sm:$0xff]   ;;  %v5705_v19 = vld [vmem:[%s8377_s1 + $0x7e0] ss:$48 sps:$4 sm:$0xff]  }
  0x29   :  { %v5765_v18 = vld [vmem:[%s8377_s1 + $0x614] ss:$48 sps:$4 sm:$0xff]   ;;  %v5763_v22 = vld [vmem:[%s8377_s1 + $0x610] ss:$48 sps:$4 sm:$0xff]  }
  0x2a   :  { %2012 = vmatpush1.bf16.msra.mxu0 %v5720_v49  ;;  %v5713_v21 = vld [vmem:[%s8377_s1 + $0x844] ss:$48 sps:$4 sm:$0xff]   ;;  %v5711_v24 = vld [vmem:[%s8377_s1 + $0x840] ss:$48 sps:$4 sm:$0xff]  }
  0x2b   :  { %1844 = vmatpush1.bf16.msra.mxu1 %v5654_v35  ;;  %2013 = vmatprep.subr.bf16.mxu0 %v5721_v50  ;;  %v5771_v23 = vld [vmem:[%s8377_s1 + $0x674] ss:$48 sps:$4 sm:$0xff]   ;;  %v5769_v26 = vld [vmem:[%s8377_s1 + $0x670] ss:$48 sps:$4 sm:$0xff]   ;;  %v5723_v35 = vld [vmem:[%s8377_s1 + $0x8] ss:$48 sps:$4 sm:$0xff]  }
  0x2c   :  { %1845 = vmatprep.subr.bf16.mxu1 %v5655_v36  ;;  %v5719_v25 = vld [vmem:[%s8377_s1 + $0x8a4] ss:$48 sps:$4 sm:$0xff]   ;;  %v5717_v27 = vld [vmem:[%s8377_s1 + $0x8a0] ss:$48 sps:$4 sm:$0xff]   ;;  %v5731_v36 = vld [vmem:[%s8377_s1 + $0x6c] ss:$48 sps:$4 sm:$0xff]  }
  0x2d   :  { %v5777_v28 = vld [vmem:[%s8377_s1 + $0x6d4] ss:$48 sps:$4 sm:$0xff]   ;;  %v5775_v32 = vld [vmem:[%s8377_s1 + $0x6d0] ss:$48 sps:$4 sm:$0xff]  }
  0x2e   :  { %2014 = vmatpush1.bf16.msra.mxu0 %v5726_v53  ;;  %v5783_v33 = vld [vmem:[%s8377_s1 + $0x734] ss:$48 sps:$4 sm:$0xff]   ;;  %v5781_v37 = vld [vmem:[%s8377_s1 + $0x730] ss:$48 sps:$4 sm:$0xff]  }
  0x2f   :  { %1846 = vmatpush1.bf16.msra.mxu1 %v5657_v39  ;;  %2015 = vmatprep.subr.bf16.mxu0 %v5727_v55  ;;  %v5789_v38 = vld [vmem:[%s8377_s1 + $0x794] ss:$48 sps:$4 sm:$0xff]   ;;  %v5729_v39 = vld [vmem:[%s8377_s1 + $0x68] ss:$48 sps:$4 sm:$0xff]   ;;  %v5787_v41 = vld [vmem:[%s8377_s1 + $0x790] ss:$48 sps:$4 sm:$0xff]  }
  0x30   :  { %1847 = vmatprep.subr.bf16.mxu1 %v5658_v40  ;;  %v5737_v40 = vld [vmem:[%s8377_s1 + $0xcc] ss:$48 sps:$4 sm:$0xff]   ;;  %v5795_v42 = vld [vmem:[%s8377_s1 + $0x7f4] ss:$48 sps:$4 sm:$0xff]   ;;  %v5793_v45 = vld [vmem:[%s8377_s1 + $0x7f0] ss:$48 sps:$4 sm:$0xff]  }
  0x31   :  { %v5801_v46 = vld [vmem:[%s8377_s1 + $0x854] ss:$48 sps:$4 sm:$0xff]   ;;  %v5799_v49 = vld [vmem:[%s8377_s1 + $0x850] ss:$48 sps:$4 sm:$0xff]   ;;  %v5753_v55 = vld [vmem:[%s8377_s1 + $0x1e8] ss:$48 sps:$4 sm:$0xff]  }
  0x32   :  { %2016 = vmatpush1.bf16.msra.mxu0 %v5732_v59  ;;  %v5807_v50 = vld [vmem:[%s8377_s1 + $0x8b4] ss:$48 sps:$4 sm:$0xff]   ;;  %v5805_v53 = vld [vmem:[%s8377_s1 + $0x8b0] ss:$48 sps:$4 sm:$0xff]   ;;  %v5759_v59 = vld [vmem:[%s8377_s1 + $0x248] ss:$48 sps:$4 sm:$0xff]  }
  0x33   :  { %1848 = vmatpush1.bf16.msra.mxu1 %v5660_v43  ;;  %2017 = vmatprep.subr.bf16.mxu0 %v5733_v60  ;;  %v5735_v43 = vld [vmem:[%s8377_s1 + $0xc8] ss:$48 sps:$4 sm:$0xff]   ;;  %v5811_v57 = vld [vmem:[%s8377_s1 + $0x20] ss:$48 sps:$4 sm:$0xff]   ;;  %v5819_v58 = vld [vmem:[%s8377_s1 + $0x84] ss:$48 sps:$4 sm:$0xff]  }
  0x34   :  { %1849 = vmatprep.subr.bf16.mxu1 %v5661_v44  ;;  %v5743_v44 = vld [vmem:[%s8377_s1 + $0x12c] ss:$48 sps:$4 sm:$0xff]   ;;  %v5867_v29 = vld [vmem:[%s8377_s1 + $0x384] ss:$48 sps:$4 sm:$0xff]  }
  0x35   :  { %v5768_v60 = vld [vmem:[%s8377_s1 + $0x2ac] ss:$48 sps:$4 sm:$0xff]  }
  0x36   :  { %2018 = vmatpush1.bf16.msra.mxu0 %v5738_v0  ;;  %v5766_v0 = vld [vmem:[%s8377_s1 + $0x2a8] ss:$48 sps:$4 sm:$0xff]  }
  0x37   :  { %1850 = vmatpush1.bf16.msra.mxu1 %v5663_v47  ;;  %2019 = vmatprep.subr.bf16.mxu0 %v5739_v1  ;;  %v5741_v47 = vld [vmem:[%s8377_s1 + $0x128] ss:$48 sps:$4 sm:$0xff]   ;;  %v5774_v1 = vld [vmem:[%s8377_s1 + $0x30c] ss:$48 sps:$4 sm:$0xff]  }
  0x38   :  { %1851 = vmatprep.subr.bf16.mxu1 %v5664_v48  ;;  %v5749_v48 = vld [vmem:[%s8377_s1 + $0x18c] ss:$48 sps:$4 sm:$0xff]  }
  0x3a   :  { %2020 = vmatpush1.bf16.msra.mxu0 %v5744_v5  ;;  %v5772_v5 = vld [vmem:[%s8377_s1 + $0x308] ss:$48 sps:$4 sm:$0xff]  }
  0x3b   :  { %1852 = vmatpush1.bf16.msra.mxu1 %v5666_v51  ;;  %2021 = vmatprep.subr.bf16.mxu0 %v5745_v6  ;;  %v5747_v51 = vld [vmem:[%s8377_s1 + $0x188] ss:$48 sps:$4 sm:$0xff]   ;;  %v5780_v6 = vld [vmem:[%s8377_s1 + $0x36c] ss:$48 sps:$4 sm:$0xff]  }
  0x3c   :  { %1853 = vmatprep.subr.bf16.mxu1 %v5669_v52  ;;  %v5755_v52 = vld [vmem:[%s8377_s1 + $0x1ec] ss:$48 sps:$4 sm:$0xff]  }
  0x3e   :  { %2022 = vmatpush1.bf16.msra.mxu0 %v5750_v9  ;;  %v5778_v9 = vld [vmem:[%s8377_s1 + $0x368] ss:$48 sps:$4 sm:$0xff]  }
  0x3f   :  { %1854 = vmatpush1.bf16.msra.mxu1 %v5672_v54  ;;  %2023 = vmatprep.subr.bf16.mxu0 %v5751_v10  ;;  %v5813_v54 = vld [vmem:[%s8377_s1 + $0x24] ss:$48 sps:$4 sm:$0xff]   ;;  %v5786_v10 = vld [vmem:[%s8377_s1 + $0x3cc] ss:$48 sps:$4 sm:$0xff]  }
  0x40   :  { %1866 = vmatprep.subr.bf16.mxu1 %v5677_v56  ;;  %v5761_v56 = vld [vmem:[%s8377_s1 + $0x24c] ss:$48 sps:$4 sm:$0xff]  }
  0x42   :  { %1856 = vmatmul.mubr.bf16.vlgmr.msra.gmra.mrb[0].mxu1 %v6681_v61  ;;  %2024 = vmatpush1.bf16.msra.mxu0 %v5756_v13  ;;  %v5784_v13 = vld [vmem:[%s8377_s1 + $0x3c8] ss:$48 sps:$4 sm:$0xff]  }
  0x43   :  { %1867 = vmatpush1.bf16.msra.mxu1 %v5675_v62  ;;  %1898 = vmatprep.mubr.bf16.mxu1 %v6463_v3  ;;  %v5817_v62 = vld [vmem:[%s8377_s1 + $0x80] ss:$48 sps:$4 sm:$0xff]  }
  0x44   :  { %1868 = vmatprep.subr.bf16.mxu1 %v5683_v63  ;;  %2025 = vmatprep.subr.bf16.mxu0 %v5757_v14  ;;  %v5825_v63 = vld [vmem:[%s8377_s1 + $0xe4] ss:$48 sps:$4 sm:$0xff]   ;;  %v5792_v14 = vld [vmem:[%s8377_s1 + $0x42c] ss:$48 sps:$4 sm:$0xff]  }
  0x46   :  { %2026 = vmatpush1.bf16.msra.mxu0 %v5762_v17  ;;  %v5790_v17 = vld [vmem:[%s8377_s1 + $0x428] ss:$48 sps:$4 sm:$0xff]  }
  0x47   :  { %1869 = vmatpush1.bf16.msra.mxu1 %v5681_v2  ;;  %2038 = vmatprep.subr.bf16.mxu0 %v5765_v18  ;;  %v5823_v2 = vld [vmem:[%s8377_s1 + $0xe0] ss:$48 sps:$4 sm:$0xff]   ;;  %v5798_v18 = vld [vmem:[%s8377_s1 + $0x48c] ss:$48 sps:$4 sm:$0xff]  }
  0x48   :  { %1870 = vmatprep.subr.bf16.mxu1 %v5689_v4  ;;  %v5831_v4 = vld [vmem:[%s8377_s1 + $0x144] ss:$48 sps:$4 sm:$0xff]  }
  0x49   :  { %2028 = vmatmul.mubr.bf16.vlgmr.msra.gmra.mrb[0].mxu0 %v6681_v61 }
  0x4a   :  { %2039 = vmatpush1.bf16.msra.mxu0 %v5763_v22  ;;  %2070 = vmatprep.mubr.bf16.mxu0 %v6463_v3  ;;  %v5796_v22 = vld [vmem:[%s8377_s1 + $0x488] ss:$48 sps:$4 sm:$0xff]  }
  0x4b   :  { %1871 = vmatpush1.bf16.msra.mxu1 %v5687_v7  ;;  %2040 = vmatprep.subr.bf16.mxu0 %v5771_v23  ;;  %v5829_v7 = vld [vmem:[%s8377_s1 + $0x140] ss:$48 sps:$4 sm:$0xff]   ;;  %v5804_v23 = vld [vmem:[%s8377_s1 + $0x4ec] ss:$48 sps:$4 sm:$0xff]  }
  0x4c   :  { %1872 = vmatprep.subr.bf16.mxu1 %v5695_v8  ;;  %v5837_v8 = vld [vmem:[%s8377_s1 + $0x1a4] ss:$48 sps:$4 sm:$0xff]  }
  0x4e   :  { %2041 = vmatpush1.bf16.msra.mxu0 %v5769_v26  ;;  %v5802_v26 = vld [vmem:[%s8377_s1 + $0x4e8] ss:$48 sps:$4 sm:$0xff]  }
  0x4f   :  { %1873 = vmatpush1.bf16.msra.mxu1 %v5693_v11  ;;  %2042 = vmatprep.subr.bf16.mxu0 %v5777_v28  ;;  %v5835_v11 = vld [vmem:[%s8377_s1 + $0x1a0] ss:$48 sps:$4 sm:$0xff]  }
  0x50   :  { %1874 = vmatprep.subr.bf16.mxu1 %v5701_v12  ;;  %v5843_v12 = vld [vmem:[%s8377_s1 + $0x204] ss:$48 sps:$4 sm:$0xff]   ;;  %v5859_v28 = vld [vmem:[%s8377_s1 + $0x320] ss:$48 sps:$4 sm:$0xff]  }
  0x52   :  { %2043 = vmatpush1.bf16.msra.mxu0 %v5775_v32  ;;  %v5865_v32 = vld [vmem:[%s8377_s1 + $0x380] ss:$48 sps:$4 sm:$0xff]  }
  0x53   :  { %1875 = vmatpush1.bf16.msra.mxu1 %v5699_v15  ;;  %2044 = vmatprep.subr.bf16.mxu0 %v5783_v33  ;;  %v5841_v15 = vld [vmem:[%s8377_s1 + $0x200] ss:$48 sps:$4 sm:$0xff]   ;;  %v5873_v33 = vld [vmem:[%s8377_s1 + $0x3e4] ss:$48 sps:$4 sm:$0xff]  }
  0x54   :  { %1876 = vmatprep.subr.bf16.mxu1 %v5707_v16  ;;  %v5849_v16 = vld [vmem:[%s8377_s1 + $0x264] ss:$48 sps:$4 sm:$0xff]  }
  0x56   :  { %2045 = vmatpush1.bf16.msra.mxu0 %v5781_v37  ;;  %v5871_v37 = vld [vmem:[%s8377_s1 + $0x3e0] ss:$48 sps:$4 sm:$0xff]  }
  0x57   :  { %1877 = vmatpush1.bf16.msra.mxu1 %v5705_v19  ;;  %2046 = vmatprep.subr.bf16.mxu0 %v5789_v38  ;;  %v5847_v19 = vld [vmem:[%s8377_s1 + $0x260] ss:$48 sps:$4 sm:$0xff]   ;;  %v5879_v38 = vld [vmem:[%s8377_s1 + $0x444] ss:$48 sps:$4 sm:$0xff]  }
  0x58   :  { %1878 = vmatprep.subr.bf16.mxu1 %v5713_v21  ;;  %v5855_v21 = vld [vmem:[%s8377_s1 + $0x2c4] ss:$48 sps:$4 sm:$0xff]  }
  0x5a   :  { %2047 = vmatpush1.bf16.msra.mxu0 %v5787_v41  ;;  %v5877_v41 = vld [vmem:[%s8377_s1 + $0x440] ss:$48 sps:$4 sm:$0xff]  }
  0x5b   :  { %1879 = vmatpush1.bf16.msra.mxu1 %v5711_v24  ;;  %2048 = vmatprep.subr.bf16.mxu0 %v5795_v42  ;;  %v5853_v24 = vld [vmem:[%s8377_s1 + $0x2c0] ss:$48 sps:$4 sm:$0xff]   ;;  %v5885_v42 = vld [vmem:[%s8377_s1 + $0x4a4] ss:$48 sps:$4 sm:$0xff]  }
  0x5c   :  { %1880 = vmatprep.subr.bf16.mxu1 %v5719_v25  ;;  %v5861_v25 = vld [vmem:[%s8377_s1 + $0x324] ss:$48 sps:$4 sm:$0xff]  }
  0x5e   :  { %2049 = vmatpush1.bf16.msra.mxu0 %v5793_v45  ;;  %v5883_v45 = vld [vmem:[%s8377_s1 + $0x4a0] ss:$48 sps:$4 sm:$0xff]  }
  0x5f   :  { %1881 = vmatpush1.bf16.msra.mxu1 %v5717_v27  ;;  %2050 = vmatprep.subr.bf16.mxu0 %v5801_v46  ;;  %v5810_v27 = vld [vmem:[%s8377_s1 + $0x54c] ss:$48 sps:$4 sm:$0xff]   ;;  %v5891_v46 = vld [vmem:[%s8377_s1 + $0x504] ss:$48 sps:$4 sm:$0xff]  }
  0x60   :  { %1909 = vmatprep.subr.bf16.mxu1 %v5725_v31  ;;  %v5816_v31 = vld [vmem:[%s8377_s1 + $0x5ac] ss:$48 sps:$4 sm:$0xff]  }
  0x62   :  { %1899 = vmatmul.mubr.bf16.vlgmr.msra.gmra.mrb[0].mxu1 %v6789_v34  ;;  %2051 = vmatpush1.bf16.msra.mxu0 %v5799_v49  ;;  %v5889_v49 = vld [vmem:[%s8377_s1 + $0x500] ss:$48 sps:$4 sm:$0xff]  }
  0x63   :  { %1910 = vmatpush1.bf16.msra.mxu1 %v5723_v35  ;;  %1941 = vmatprep.mubr.bf16.mxu1 %v6557_v20  ;;  %v5814_v35 = vld [vmem:[%s8377_s1 + $0x5a8] ss:$48 sps:$4 sm:$0xff]  }
  0x64   :  { %1911 = vmatprep.subr.bf16.mxu1 %v5731_v36  ;;  %2052 = vmatprep.subr.bf16.mxu0 %v5807_v50  ;;  %v5822_v36 = vld [vmem:[%s8377_s1 + $0x60c] ss:$48 sps:$4 sm:$0xff]   ;;  %v5897_v50 = vld [vmem:[%s8377_s1 + $0x564] ss:$48 sps:$4 sm:$0xff]  }
  0x66   :  { %2053 = vmatpush1.bf16.msra.mxu0 %v5805_v53  ;;  %v5895_v53 = vld [vmem:[%s8377_s1 + $0x560] ss:$48 sps:$4 sm:$0xff]  }
  0x67   :  { %1912 = vmatpush1.bf16.msra.mxu1 %v5729_v39  ;;  %2167 = vmatprep.subr.bf16.mxu0 %v5813_v54  ;;  %v5820_v39 = vld [vmem:[%s8377_s1 + $0x608] ss:$48 sps:$4 sm:$0xff]   ;;  %v5903_v54 = vld [vmem:[%s8377_s1 + $0x5c4] ss:$48 sps:$4 sm:$0xff]  }
  0x68   :  { %1913 = vmatprep.subr.bf16.mxu1 %v5737_v40  ;;  %v5828_v40 = vld [vmem:[%s8377_s1 + $0x66c] ss:$48 sps:$4 sm:$0xff]  }
  0x69   :  { %2071 = vmatmul.mubr.bf16.vlgmr.msra.gmra.mrb[0].mxu0 %v6789_v34 }
  0x6a   :  { %2168 = vmatpush1.bf16.msra.mxu0 %v5811_v57  ;;  %2199 = vmatprep.mubr.bf16.mxu0 %v6557_v20  ;;  %v5901_v57 = vld [vmem:[%s8377_s1 + $0x5c0] ss:$48 sps:$4 sm:$0xff]  }
  0x6b   :  { %1914 = vmatpush1.bf16.msra.mxu1 %v5735_v43  ;;  %2169 = vmatprep.subr.bf16.mxu0 %v5819_v58  ;;  %v5826_v43 = vld [vmem:[%s8377_s1 + $0x668] ss:$48 sps:$4 sm:$0xff]   ;;  %v5909_v58 = vld [vmem:[%s8377_s1 + $0x624] ss:$48 sps:$4 sm:$0xff]  }
  0x6c   :  { %1915 = vmatprep.subr.bf16.mxu1 %v5743_v44  ;;  %v5834_v44 = vld [vmem:[%s8377_s1 + $0x6cc] ss:$48 sps:$4 sm:$0xff]  }
  0x6e   :  { %2170 = vmatpush1.bf16.msra.mxu0 %v5817_v62  ;;  %v5907_v62 = vld [vmem:[%s8377_s1 + $0x620] ss:$48 sps:$4 sm:$0xff]  }
  0x6f   :  { %1916 = vmatpush1.bf16.msra.mxu1 %v5741_v47  ;;  %2171 = vmatprep.subr.bf16.mxu0 %v5825_v63  ;;  %v5832_v47 = vld [vmem:[%s8377_s1 + $0x6c8] ss:$48 sps:$4 sm:$0xff]   ;;  %v5915_v63 = vld [vmem:[%s8377_s1 + $0x684] ss:$48 sps:$4 sm:$0xff]  }
  0x70   :  { %1917 = vmatprep.subr.bf16.mxu1 %v5749_v48  ;;  %v5840_v48 = vld [vmem:[%s8377_s1 + $0x72c] ss:$48 sps:$4 sm:$0xff]  }
  0x72   :  { %2172 = vmatpush1.bf16.msra.mxu0 %v5823_v2  ;;  %v5913_v2 = vld [vmem:[%s8377_s1 + $0x680] ss:$48 sps:$4 sm:$0xff]  }
  0x73   :  { %1918 = vmatpush1.bf16.msra.mxu1 %v5747_v51  ;;  %2173 = vmatprep.subr.bf16.mxu0 %v5831_v4  ;;  %v5838_v51 = vld [vmem:[%s8377_s1 + $0x728] ss:$48 sps:$4 sm:$0xff]   ;;  %v5921_v4 = vld [vmem:[%s8377_s1 + $0x6e4] ss:$48 sps:$4 sm:$0xff]  }
  0x74   :  { %1919 = vmatprep.subr.bf16.mxu1 %v5755_v52  ;;  %v5846_v52 = vld [vmem:[%s8377_s1 + $0x78c] ss:$48 sps:$4 sm:$0xff]  }
  0x76   :  { %2174 = vmatpush1.bf16.msra.mxu0 %v5829_v7  ;;  %v5919_v7 = vld [vmem:[%s8377_s1 + $0x6e0] ss:$48 sps:$4 sm:$0xff]  }
  0x77   :  { %1920 = vmatpush1.bf16.msra.mxu1 %v5753_v55  ;;  %2175 = vmatprep.subr.bf16.mxu0 %v5837_v8  ;;  %v5844_v55 = vld [vmem:[%s8377_s1 + $0x788] ss:$48 sps:$4 sm:$0xff]   ;;  %v5927_v8 = vld [vmem:[%s8377_s1 + $0x744] ss:$48 sps:$4 sm:$0xff]  }
  0x78   :  { %1921 = vmatprep.subr.bf16.mxu1 %v5761_v56  ;;  %v5852_v56 = vld [vmem:[%s8377_s1 + $0x7ec] ss:$48 sps:$4 sm:$0xff]  }
  0x7a   :  { %2176 = vmatpush1.bf16.msra.mxu0 %v5835_v11  ;;  %v5925_v11 = vld [vmem:[%s8377_s1 + $0x740] ss:$48 sps:$4 sm:$0xff]  }
  0x7b   :  { %1922 = vmatpush1.bf16.msra.mxu1 %v5759_v59  ;;  %2177 = vmatprep.subr.bf16.mxu0 %v5843_v12  ;;  %v5850_v59 = vld [vmem:[%s8377_s1 + $0x7e8] ss:$48 sps:$4 sm:$0xff]   ;;  %v5933_v12 = vld [vmem:[%s8377_s1 + $0x7a4] ss:$48 sps:$4 sm:$0xff]  }
  0x7c   :  { %1923 = vmatprep.subr.bf16.mxu1 %v5768_v60  ;;  %v5858_v60 = vld [vmem:[%s8377_s1 + $0x84c] ss:$48 sps:$4 sm:$0xff]  }
  0x7e   :  { %2178 = vmatpush1.bf16.msra.mxu0 %v5841_v15  ;;  %v5931_v15 = vld [vmem:[%s8377_s1 + $0x7a0] ss:$48 sps:$4 sm:$0xff]  }
  0x7f   :  { %1924 = vmatpush1.bf16.msra.mxu1 %v5766_v0  ;;  %2179 = vmatprep.subr.bf16.mxu0 %v5849_v16  ;;  %v5856_v0 = vld [vmem:[%s8377_s1 + $0x848] ss:$48 sps:$4 sm:$0xff]   ;;  %v5939_v16 = vld [vmem:[%s8377_s1 + $0x804] ss:$48 sps:$4 sm:$0xff]  }
  0x80   :  { %1925 = vmatprep.subr.bf16.mxu1 %v5774_v1  ;;  %v5864_v1 = vld [vmem:[%s8377_s1 + $0x8ac] ss:$48 sps:$4 sm:$0xff]  }
  0x82   :  { %2180 = vmatpush1.bf16.msra.mxu0 %v5847_v19  ;;  %v5937_v19 = vld [vmem:[%s8377_s1 + $0x800] ss:$48 sps:$4 sm:$0xff]  }
  0x83   :  { %1926 = vmatpush1.bf16.msra.mxu1 %v5772_v5  ;;  %2181 = vmatprep.subr.bf16.mxu0 %v5855_v21  ;;  %v5862_v5 = vld [vmem:[%s8377_s1 + $0x8a8] ss:$48 sps:$4 sm:$0xff]   ;;  %v5945_v21 = vld [vmem:[%s8377_s1 + $0x864] ss:$48 sps:$4 sm:$0xff]  }
  0x84   :  { %1927 = vmatprep.subr.bf16.mxu1 %v5780_v6  ;;  %v5870_v6 = vld [vmem:[%s8377_s1 + $0x1c] ss:$48 sps:$4 sm:$0xff]  }
  0x86   :  { %2182 = vmatpush1.bf16.msra.mxu0 %v5853_v24  ;;  %v5943_v24 = vld [vmem:[%s8377_s1 + $0x860] ss:$48 sps:$4 sm:$0xff]  }
  0x87   :  { %1928 = vmatpush1.bf16.msra.mxu1 %v5778_v9  ;;  %2183 = vmatprep.subr.bf16.mxu0 %v5861_v25  ;;  %v5868_v9 = vld [vmem:[%s8377_s1 + $0x18] ss:$48 sps:$4 sm:$0xff]   ;;  %v5951_v25 = vld [vmem:[%s8377_s1 + $0x8c4] ss:$48 sps:$4 sm:$0xff]  }
  0x88   :  { %1929 = vmatprep.subr.bf16.mxu1 %v5786_v10  ;;  %v5876_v10 = vld [vmem:[%s8377_s1 + $0x7c] ss:$48 sps:$4 sm:$0xff]  }
  0x8a   :  { %2184 = vmatpush1.bf16.msra.mxu0 %v5859_v28  ;;  %v5949_v28 = vld [vmem:[%s8377_s1 + $0x8c0] ss:$48 sps:$4 sm:$0xff]  }
  0x8b   :  { %1930 = vmatpush1.bf16.msra.mxu1 %v5784_v13  ;;  %2185 = vmatprep.subr.bf16.mxu0 %v5867_v29  ;;  %v5874_v13 = vld [vmem:[%s8377_s1 + $0x78] ss:$48 sps:$4 sm:$0xff]   ;;  %v5960_v29 = vld [vmem:[%s8379_s3 + $0x4] ss:$12 sps:$4 sm:$0xff]  }
  0x8c   :  { %1931 = vmatprep.subr.bf16.mxu1 %v5792_v14  ;;  %v5882_v14 = vld [vmem:[%s8377_s1 + $0xdc] ss:$48 sps:$4 sm:$0xff]  }
  0x8e   :  { %2186 = vmatpush1.bf16.msra.mxu0 %v5865_v32  ;;  %v5958_v32 = vld [vmem:[%s8379_s3] ss:$12 sps:$4 sm:$0xff]  }
  0x8f   :  { %1932 = vmatpush1.bf16.msra.mxu1 %v5790_v17  ;;  %2187 = vmatprep.subr.bf16.mxu0 %v5873_v33  ;;  %v5880_v17 = vld [vmem:[%s8377_s1 + $0xd8] ss:$48 sps:$4 sm:$0xff]  }
  0x90   :  { %1933 = vmatprep.subr.bf16.mxu1 %v5798_v18  ;;  %v5888_v18 = vld [vmem:[%s8377_s1 + $0x13c] ss:$48 sps:$4 sm:$0xff]  }
  0x91   :  { %v5966_v33 = vld [vmem:[%s8379_s3 + $0x1c] ss:$12 sps:$4 sm:$0xff]  }
  0x92   :  { %2188 = vmatpush1.bf16.msra.mxu0 %v5871_v37  ;;  %v5964_v37 = vld [vmem:[%s8379_s3 + $0x18] ss:$12 sps:$4 sm:$0xff]  }
  0x93   :  { %1934 = vmatpush1.bf16.msra.mxu1 %v5796_v22  ;;  %2189 = vmatprep.subr.bf16.mxu0 %v5879_v38  ;;  %v5886_v22 = vld [vmem:[%s8377_s1 + $0x138] ss:$48 sps:$4 sm:$0xff]   ;;  %v5972_v38 = vld [vmem:[%s8379_s3 + $0x34] ss:$12 sps:$4 sm:$0xff]  }
  0x94   :  { %1935 = vmatprep.subr.bf16.mxu1 %v5804_v23  ;;  %v5894_v23 = vld [vmem:[%s8377_s1 + $0x19c] ss:$48 sps:$4 sm:$0xff]  }
  0x96   :  { %2190 = vmatpush1.bf16.msra.mxu0 %v5877_v41  ;;  %v5970_v41 = vld [vmem:[%s8379_s3 + $0x30] ss:$12 sps:$4 sm:$0xff]  }
  0x97   :  { %1936 = vmatpush1.bf16.msra.mxu1 %v5802_v26  ;;  %2191 = vmatprep.subr.bf16.mxu0 %v5885_v42  ;;  %v5892_v26 = vld [vmem:[%s8377_s1 + $0x198] ss:$48 sps:$4 sm:$0xff]  }
  0x98   :  { %1937 = vmatprep.subr.bf16.mxu1 %v5810_v27  ;;  %v5900_v27 = vld [vmem:[%s8377_s1 + $0x1fc] ss:$48 sps:$4 sm:$0xff]  }
  0x99   :  { %v5978_v42 = vld [vmem:[%s8379_s3 + $0x4c] ss:$12 sps:$4 sm:$0xff]  }
  0x9a   :  { %2192 = vmatpush1.bf16.msra.mxu0 %v5883_v45  ;;  %v5976_v45 = vld [vmem:[%s8379_s3 + $0x48] ss:$12 sps:$4 sm:$0xff]  }
  0x9b   :  { %1938 = vmatpush1.bf16.msra.mxu1 %v5808_v30  ;;  %2193 = vmatprep.subr.bf16.mxu0 %v5891_v46  ;;  %v5898_v30 = vld [vmem:[%s8377_s1 + $0x1f8] ss:$48 sps:$4 sm:$0xff]   ;;  %v5984_v46 = vld [vmem:[%s8379_s3 + $0x64] ss:$12 sps:$4 sm:$0xff]  }
  0x9c   :  { %1939 = vmatprep.subr.bf16.mxu1 %v5816_v31  ;;  %v5906_v31 = vld [vmem:[%s8377_s1 + $0x25c] ss:$48 sps:$4 sm:$0xff]  }
  0x9e   :  { %2194 = vmatpush1.bf16.msra.mxu0 %v5889_v49  ;;  %v5982_v49 = vld [vmem:[%s8379_s3 + $0x60] ss:$12 sps:$4 sm:$0xff]  }
  0x9f   :  { %1940 = vmatpush1.bf16.msra.mxu1 %v5814_v35  ;;  %2195 = vmatprep.subr.bf16.mxu0 %v5897_v50  ;;  %v5904_v35 = vld [vmem:[%s8377_s1 + $0x258] ss:$48 sps:$4 sm:$0xff]  }
  0xa0   :  { %1952 = vmatprep.subr.bf16.mxu1 %v5822_v36  ;;  %v5912_v36 = vld [vmem:[%s8377_s1 + $0x2bc] ss:$48 sps:$4 sm:$0xff]  }
  0xa1   :  { %v5990_v50 = vld [vmem:[%s8379_s3 + $0x7c] ss:$12 sps:$4 sm:$0xff]  }
  0xa2   :  { %1942 = vmatmul.mubr.bf16.vlgmr.msra.gmra.mrb[4].mxu1 %v6681_v61  ;;  %2196 = vmatpush1.bf16.msra.mxu0 %v5895_v53  ;;  %v5988_v53 = vld [vmem:[%s8379_s3 + $0x78] ss:$12 sps:$4 sm:$0xff]  }
  0xa3   :  { %1953 = vmatpush1.bf16.msra.mxu1 %v5820_v39  ;;  %1984 = vmatprep.mubr.bf16.mxu1 %v6463_v3  ;;  %v5910_v39 = vld [vmem:[%s8377_s1 + $0x2b8] ss:$48 sps:$4 sm:$0xff]  }
  0xa4   :  { %1954 = vmatprep.subr.bf16.mxu1 %v5828_v40  ;;  %2197 = vmatprep.subr.bf16.mxu0 %v5903_v54  ;;  %v5918_v40 = vld [vmem:[%s8377_s1 + $0x31c] ss:$48 sps:$4 sm:$0xff]   ;;  %v5996_v54 = vld [vmem:[%s8379_s3 + $0x94] ss:$12 sps:$4 sm:$0xff]  }
  0xa6   :  { %2198 = vmatpush1.bf16.msra.mxu0 %v5901_v57  ;;  %v5994_v57 = vld [vmem:[%s8379_s3 + $0x90] ss:$12 sps:$4 sm:$0xff]  }
  0xa7   :  { %1955 = vmatpush1.bf16.msra.mxu1 %v5826_v43  ;;  %2210 = vmatprep.subr.bf16.mxu0 %v5909_v58  ;;  %v5916_v43 = vld [vmem:[%s8377_s1 + $0x318] ss:$48 sps:$4 sm:$0xff]  }
  0xa8   :  { %1956 = vmatprep.subr.bf16.mxu1 %v5834_v44  ;;  %v5924_v44 = vld [vmem:[%s8377_s1 + $0x37c] ss:$48 sps:$4 sm:$0xff]  }
  0xa9   :  { %2200 = vmatmul.mubr.bf16.vlgmr.msra.gmra.mrb[4].mxu0 %v6681_v61  ;;  %v6002_v58 = vld [vmem:[%s8379_s3 + $0xac] ss:$12 sps:$4 sm:$0xff]  }
  0xaa   :  { %2211 = vmatpush1.bf16.msra.mxu0 %v5907_v62  ;;  %2242 = vmatprep.mubr.bf16.mxu0 %v6463_v3  ;;  %v6000_v62 = vld [vmem:[%s8379_s3 + $0xa8] ss:$12 sps:$4 sm:$0xff]  }
  0xab   :  { %1957 = vmatpush1.bf16.msra.mxu1 %v5832_v47  ;;  %2212 = vmatprep.subr.bf16.mxu0 %v5915_v63  ;;  %v5922_v47 = vld [vmem:[%s8377_s1 + $0x378] ss:$48 sps:$4 sm:$0xff]   ;;  %v6008_v63 = vld [vmem:[%s8379_s3 + $0xc4] ss:$12 sps:$4 sm:$0xff]  }
  0xac   :  { %1958 = vmatprep.subr.bf16.mxu1 %v5840_v48  ;;  %v5930_v48 = vld [vmem:[%s8377_s1 + $0x3dc] ss:$48 sps:$4 sm:$0xff]  }
  0xae   :  { %2213 = vmatpush1.bf16.msra.mxu0 %v5913_v2  ;;  %v6006_v2 = vld [vmem:[%s8379_s3 + $0xc0] ss:$12 sps:$4 sm:$0xff]  }
  0xaf   :  { %1959 = vmatpush1.bf16.msra.mxu1 %v5838_v51  ;;  %2214 = vmatprep.subr.bf16.mxu0 %v5921_v4  ;;  %v5928_v51 = vld [vmem:[%s8377_s1 + $0x3d8] ss:$48 sps:$4 sm:$0xff]  }
  0xb0   :  { %1960 = vmatprep.subr.bf16.mxu1 %v5846_v52  ;;  %v5936_v52 = vld [vmem:[%s8377_s1 + $0x43c] ss:$48 sps:$4 sm:$0xff]  }
  0xb1   :  { %v6014_v4 = vld [vmem:[%s8379_s3 + $0xdc] ss:$12 sps:$4 sm:$0xff]  }
  0xb2   :  { %2215 = vmatpush1.bf16.msra.mxu0 %v5919_v7  ;;  %v6012_v7 = vld [vmem:[%s8379_s3 + $0xd8] ss:$12 sps:$4 sm:$0xff]  }
  0xb3   :  { %1961 = vmatpush1.bf16.msra.mxu1 %v5844_v55  ;;  %2216 = vmatprep.subr.bf16.mxu0 %v5927_v8  ;;  %v5934_v55 = vld [vmem:[%s8377_s1 + $0x438] ss:$48 sps:$4 sm:$0xff]   ;;  %v6020_v8 = vld [vmem:[%s8379_s3 + $0xf4] ss:$12 sps:$4 sm:$0xff]  }
  0xb4   :  { %1962 = vmatprep.subr.bf16.mxu1 %v5852_v56  ;;  %v5942_v56 = vld [vmem:[%s8377_s1 + $0x49c] ss:$48 sps:$4 sm:$0xff]  }
  0xb6   :  { %2217 = vmatpush1.bf16.msra.mxu0 %v5925_v11  ;;  %v6018_v11 = vld [vmem:[%s8379_s3 + $0xf0] ss:$12 sps:$4 sm:$0xff]  }
  0xb7   :  { %1963 = vmatpush1.bf16.msra.mxu1 %v5850_v59  ;;  %2218 = vmatprep.subr.bf16.mxu0 %v5933_v12  ;;  %v5940_v59 = vld [vmem:[%s8377_s1 + $0x498] ss:$48 sps:$4 sm:$0xff]  }
  0xb8   :  { %1964 = vmatprep.subr.bf16.mxu1 %v5858_v60  ;;  %v5948_v60 = vld [vmem:[%s8377_s1 + $0x4fc] ss:$48 sps:$4 sm:$0xff]   ;;  %v5961_v12 = vld [vmem:[%s8377_s1 + $0x618] ss:$48 sps:$4 sm:$0xff]  }
  0xba   :  { %2219 = vmatpush1.bf16.msra.mxu0 %v5931_v15  ;;  %v6024_v15 = vld [vmem:[%s8379_s3 + $0x108] ss:$12 sps:$4 sm:$0xff]  }
  0xbb   :  { %1965 = vmatpush1.bf16.msra.mxu1 %v5856_v0  ;;  %2220 = vmatprep.subr.bf16.mxu0 %v5939_v16  ;;  %v5946_v0 = vld [vmem:[%s8377_s1 + $0x4f8] ss:$48 sps:$4 sm:$0xff]   ;;  %v6032_v16 = vld [vmem:[%s8379_s3 + $0x124] ss:$12 sps:$4 sm:$0xff]  }
  0xbc   :  { %1966 = vmatprep.subr.bf16.mxu1 %v5864_v1  ;;  %v5954_v1 = vld [vmem:[%s8377_s1 + $0x55c] ss:$48 sps:$4 sm:$0xff]  }
  0xbe   :  { %2221 = vmatpush1.bf16.msra.mxu0 %v5937_v19  ;;  %v6030_v19 = vld [vmem:[%s8379_s3 + $0x120] ss:$12 sps:$4 sm:$0xff]  }
  0xbf   :  { %1967 = vmatpush1.bf16.msra.mxu1 %v5862_v5  ;;  %2222 = vmatprep.subr.bf16.mxu0 %v5945_v21  ;;  %v5952_v5 = vld [vmem:[%s8377_s1 + $0x558] ss:$48 sps:$4 sm:$0xff]  }
  0xc0   :  { %2081 = vmatprep.subr.bf16.mxu1 %v5870_v6  ;;  %v5957_v6 = vld [vmem:[%s8377_s1 + $0x5bc] ss:$48 sps:$4 sm:$0xff]  }
  0xc1   :  { %v6038_v21 = vld [vmem:[%s8379_s3 + $0x13c] ss:$12 sps:$4 sm:$0xff]  }
  0xc2   :  { %1985 = vmatmul.mubr.bf16.vlgmr.msra.gmra.mrb[4].mxu1 %v6789_v34  ;;  %2223 = vmatpush1.bf16.msra.mxu0 %v5943_v24  ;;  %v6036_v24 = vld [vmem:[%s8379_s3 + $0x138] ss:$12 sps:$4 sm:$0xff]  }
  0xc3   :  { %2082 = vmatpush1.bf16.msra.mxu1 %v5868_v9  ;;  %2113 = vmatprep.mubr.bf16.mxu1 %v6557_v20  ;;  %v5955_v9 = vld [vmem:[%s8377_s1 + $0x5b8] ss:$48 sps:$4 sm:$0xff]  }
  0xc4   :  { %2083 = vmatprep.subr.bf16.mxu1 %v5876_v10  ;;  %2224 = vmatprep.subr.bf16.mxu0 %v5951_v25  ;;  %v5963_v10 = vld [vmem:[%s8377_s1 + $0x61c] ss:$48 sps:$4 sm:$0xff]   ;;  %v6044_v25 = vld [vmem:[%s8379_s3 + $0x154] ss:$12 sps:$4 sm:$0xff]  }
  0xc6   :  { %2225 = vmatpush1.bf16.msra.mxu0 %v5949_v28  ;;  %v6042_v28 = vld [vmem:[%s8379_s3 + $0x150] ss:$12 sps:$4 sm:$0xff]  }
  0xc7   :  { %2084 = vmatpush1.bf16.msra.mxu1 %v5874_v13  ;;  %4312 = vmatprep.subr.bf16.mxu0 %v5960_v29  ;;  %v6026_v13 = vld [vmem:[%s8379_s3 + $0x10c] ss:$12 sps:$4 sm:$0xff]  }
  0xc8   :  { %2085 = vmatprep.subr.bf16.mxu1 %v5882_v14  ;;  %v5969_v14 = vld [vmem:[%s8377_s1 + $0x67c] ss:$48 sps:$4 sm:$0xff]  }
  0xc9   :  { %2243 = vmatmul.mubr.bf16.vlgmr.msra.gmra.mrb[4].mxu0 %v6789_v34  ;;  %v6050_v29 = vld [vmem:[%s8379_s3 + $0x16c] ss:$12 sps:$4 sm:$0xff]  }
  0xca   :  { %4313 = vmatpush1.bf16.msra.mxu0 %v5958_v32  ;;  %v6048_v32 = vld [vmem:[%s8379_s3 + $0x168] ss:$12 sps:$4 sm:$0xff]  }
  0xcb   :  { %2086 = vmatpush1.bf16.msra.mxu1 %v5880_v17  ;;  %4314 = vmatprep.subr.bf16.mxu0 %v5966_v33  ;;  %v5967_v17 = vld [vmem:[%s8377_s1 + $0x678] ss:$48 sps:$4 sm:$0xff]   ;;  %v6080_v33 = vld [vmem:[%s8379_s3 + $0x184] ss:$12 sps:$4 sm:$0xff]  }
  0xcc   :  { %2087 = vmatprep.subr.bf16.mxu1 %v5888_v18  ;;  %v5975_v18 = vld [vmem:[%s8377_s1 + $0x6dc] ss:$48 sps:$4 sm:$0xff]  }
  0xce   :  { %4315 = vmatpush1.bf16.msra.mxu0 %v5964_v37  ;;  %v5997_v37 = vld [vmem:[%s8377_s1 + $0x858] ss:$48 sps:$4 sm:$0xff]  }
  0xcf   :  { %2088 = vmatpush1.bf16.msra.mxu1 %v5886_v22  ;;  %4316 = vmatprep.subr.bf16.mxu0 %v5972_v38  ;;  %v5973_v22 = vld [vmem:[%s8377_s1 + $0x6d8] ss:$48 sps:$4 sm:$0xff]   ;;  %v6005_v38 = vld [vmem:[%s8377_s1 + $0x8bc] ss:$48 sps:$4 sm:$0xff]  }
  0xd0   :  { %2089 = vmatprep.subr.bf16.mxu1 %v5894_v23  ;;  %v5981_v23 = vld [vmem:[%s8377_s1 + $0x73c] ss:$48 sps:$4 sm:$0xff]  }
  0xd2   :  { %4317 = vmatpush1.bf16.msra.mxu0 %v5970_v41  ;;  %v6009_v41 = vld [vmem:[%s8377_s1 + $0x28] ss:$48 sps:$4 sm:$0xff]  }
  0xd3   :  { %2090 = vmatpush1.bf16.msra.mxu1 %v5892_v26  ;;  %4318 = vmatprep.subr.bf16.mxu0 %v5978_v42  ;;  %v5979_v26 = vld [vmem:[%s8377_s1 + $0x738] ss:$48 sps:$4 sm:$0xff]   ;;  %v6017_v42 = vld [vmem:[%s8377_s1 + $0x8c] ss:$48 sps:$4 sm:$0xff]  }
  0xd4   :  { %2091 = vmatprep.subr.bf16.mxu1 %v5900_v27  ;;  %v5987_v27 = vld [vmem:[%s8377_s1 + $0x79c] ss:$48 sps:$4 sm:$0xff]  }
  0xd6   :  { %4319 = vmatpush1.bf16.msra.mxu0 %v5976_v45  ;;  %v6021_v45 = vld [vmem:[%s8377_s1 + $0xe8] ss:$48 sps:$4 sm:$0xff]  }
  0xd7   :  { %2092 = vmatpush1.bf16.msra.mxu1 %v5898_v30  ;;  %4320 = vmatprep.subr.bf16.mxu0 %v5984_v46  ;;  %v5985_v30 = vld [vmem:[%s8377_s1 + $0x798] ss:$48 sps:$4 sm:$0xff]   ;;  %v323_v46 = vlaneseq }
  0xd8   :  { %2093 = vmatprep.subr.bf16.mxu1 %v5906_v31  ;;  %v5993_v31 = vld [vmem:[%s8377_s1 + $0x7fc] ss:$48 sps:$4 sm:$0xff]  }
  0xda   :  { %4321 = vmatpush1.bf16.msra.mxu0 %v5982_v49  ;;  %v7385_v49 = vshrl.u32 %v323_v46, 7  ;;  %v6066_v46 = vld [vmem:[%s8377_s1 + $0x4a8] ss:$48 sps:$4 sm:$0xff]  }
  0xdb   :  { %2094 = vmatpush1.bf16.msra.mxu1 %v5904_v35  ;;  %4322 = vmatprep.subr.bf16.mxu0 %v5990_v50  ;;  %v5991_v35 = vld [vmem:[%s8377_s1 + $0x7f8] ss:$48 sps:$4 sm:$0xff]  }
  0xdc   :  { %2095 = vmatprep.subr.bf16.mxu1 %v5912_v36  ;;  %v5999_v36 = vld [vmem:[%s8377_s1 + $0x85c] ss:$48 sps:$4 sm:$0xff]   ;;  %v6033_v50 = vld [vmem:[%s8377_s1 + $0x1a8] ss:$48 sps:$4 sm:$0xff]  }
  0xde   :  { %4323 = vmatpush1.bf16.msra.mxu0 %v5988_v53  ;;  %v6041_v53 = vld [vmem:[%s8377_s1 + $0x20c] ss:$48 sps:$4 sm:$0xff]  }
  0xdf   :  { %2096 = vmatpush1.bf16.msra.mxu1 %v5910_v39  ;;  %4324 = vmatprep.subr.bf16.mxu0 %v5996_v54  ;;  %v6003_v39 = vld [vmem:[%s8377_s1 + $0x8b8] ss:$48 sps:$4 sm:$0xff]   ;;  %v7405_v54 = vsub.s32 1, %v7385_v49 }
  0xe0   :  { %2097 = vmatprep.subr.bf16.mxu1 %v5918_v40  ;;  %v6011_v40 = vld [vmem:[%s8377_s1 + $0x2c] ss:$48 sps:$4 sm:$0xff]  }
  0xe2   :  { %4325 = vmatpush1.bf16.msra.mxu0 %v5994_v57  ;;  %v6047_v57 = vld [vmem:[%s8377_s1 + $0x26c] ss:$48 sps:$4 sm:$0xff]  }
  0xe3   :  { %2098 = vmatpush1.bf16.msra.mxu1 %v5916_v43  ;;  %4326 = vmatprep.subr.bf16.mxu0 %v6002_v58  ;;  %v6015_v43 = vld [vmem:[%s8377_s1 + $0x88] ss:$48 sps:$4 sm:$0xff]  }
  0xe4   :  { %2099 = vmatprep.subr.bf16.mxu1 %v5924_v44  ;;  %v6023_v44 = vld [vmem:[%s8377_s1 + $0xec] ss:$48 sps:$4 sm:$0xff]  }
  0xe6   :  { %4327 = vmatpush1.bf16.msra.mxu0 %v6000_v62 }
  0xe7   :  { %2100 = vmatpush1.bf16.msra.mxu1 %v5922_v47  ;;  %4328 = vmatprep.subr.bf16.mxu0 %v6008_v63  ;;  %v6029_v47 = vld [vmem:[%s8377_s1 + $0x14c] ss:$48 sps:$4 sm:$0xff]   ;;  %v6045_v63 = vld [vmem:[%s8377_s1 + $0x268] ss:$48 sps:$4 sm:$0xff]  }
  0xe8   :  { %2101 = vmatprep.subr.bf16.mxu1 %v5930_v48  ;;  %v6027_v48 = vld [vmem:[%s8377_s1 + $0x148] ss:$48 sps:$4 sm:$0xff]  }
  0xea   :  { %4329 = vmatpush1.bf16.msra.mxu0 %v6006_v2 }
  0xeb   :  { %2102 = vmatpush1.bf16.msra.mxu1 %v5928_v51  ;;  %4330 = vmatprep.subr.bf16.mxu0 %v6014_v4  ;;  %v7396_v51 = vld [vmem:[%s8378_s2] sm:$0xff] }
  0xec   :  { %2103 = vmatprep.subr.bf16.mxu1 %v5936_v52  ;;  %v7399_v52 = vsub.s32 0, %v7385_v49  ;;  %v330_v58 = vrot.slane %v7396_v51, %v7405_v54 }
  0xee   :  { %4331 = vmatpush1.bf16.msra.mxu0 %v6012_v7  ;;  %v6051_v7 = vld [vmem:[%s8377_s1 + $0x2c8] ss:$48 sps:$4 sm:$0xff]  }
  0xef   :  { %2104 = vmatpush1.bf16.msra.mxu1 %v5934_v55  ;;  %4332 = vmatprep.subr.bf16.mxu0 %v6020_v8  ;;  %v6039_v55 = vld [vmem:[%s8377_s1 + $0x208] ss:$48 sps:$4 sm:$0xff]  }
  0xf0   :  { %2105 = vmatprep.subr.bf16.mxu1 %v5942_v56  ;;  %v326_v56 = vrot.slane %v7396_v51, %v7399_v52 }
  0xf2   :  { %4333 = vmatpush1.bf16.msra.mxu0 %v6018_v11  ;;  %v6056_v11 = vld [vmem:[%s8377_s1 + $0x32c] ss:$48 sps:$4 sm:$0xff]  }
  0xf3   :  { %2106 = vmatpush1.bf16.msra.mxu1 %v5940_v59  ;;  %4334 = vmatprep.subr.bf16.mxu0 %v6026_v13 }
  0xf4   :  { %2107 = vmatprep.subr.bf16.mxu1 %v5948_v60 }
  0xf6   :  { %4335 = vmatpush1.bf16.msra.mxu0 %v6024_v15  ;;  %v6054_v15 = vld [vmem:[%s8377_s1 + $0x328] ss:$48 sps:$4 sm:$0xff]  }
  0xf7   :  { %2108 = vmatpush1.bf16.msra.mxu1 %v5946_v0  ;;  %4336 = vmatprep.subr.bf16.mxu0 %v6032_v16  ;;  %v6053_v0 = vld [vmem:[%s8377_s1 + $0x2cc] ss:$48 sps:$4 sm:$0xff]  }
  0xf8   :  { %2109 = vmatprep.subr.bf16.mxu1 %v5954_v1  ;;  %v6078_v16 = vld [vmem:[%s8379_s3 + $0x180] ss:$12 sps:$4 sm:$0xff]  }
  0xfa   :  { %4337 = vmatpush1.bf16.msra.mxu0 %v6030_v19  ;;  %v6084_v19 = vld [vmem:[%s8379_s3 + $0x198] ss:$12 sps:$4 sm:$0xff]  }
  0xfb   :  { %2110 = vmatpush1.bf16.msra.mxu1 %v5952_v5  ;;  %4338 = vmatprep.subr.bf16.mxu0 %v6038_v21  ;;  %v6057_v21 = vld [vmem:[%s8377_s1 + $0x388] ss:$48 sps:$4 sm:$0xff]  }
  0xfc   :  { %2111 = vmatprep.subr.bf16.mxu1 %v5957_v6 }
  0xfe   :  { %4339 = vmatpush1.bf16.msra.mxu0 %v6036_v24  ;;  %v341_v24 = vsub.s32 4, %v7385_v49 }
  0xff   :  { %2112 = vmatpush1.bf16.msra.mxu1 %v5955_v9  ;;  %4340 = vmatprep.subr.bf16.mxu0 %v6044_v25  ;;  %v345_v25 = vsub.s32 5, %v7385_v49 }
 0x100   :  { %2124 = vmatprep.subr.bf16.mxu1 %v5963_v10 }
 0x102   :  { %2114 = vmatmul.mubr.bf16.vlgmr.msra.gmra.mrb[8].mxu1 %v6681_v61  ;;  %4341 = vmatpush1.bf16.msra.mxu0 %v6042_v28  ;;  %v6065_v28 = vld [vmem:[%s8377_s1 + $0x44c] ss:$48 sps:$4 sm:$0xff]  }
 0x103   :  { %2125 = vmatpush1.bf16.msra.mxu1 %v5961_v12  ;;  %2156 = vmatprep.mubr.bf16.mxu1 %v6463_v3 }
 0x104   :  { %2126 = vmatprep.subr.bf16.mxu1 %v5969_v14  ;;  %4342 = vmatprep.subr.bf16.mxu0 %v6050_v29  ;;  %v6098_v29 = vld [vmem:[%s8379_s3 + $0x1cc] ss:$12 sps:$4 sm:$0xff]  }
 0x106   :  { %4343 = vmatpush1.bf16.msra.mxu0 %v6048_v32  ;;  %v6063_v32 = vld [vmem:[%s8377_s1 + $0x448] ss:$48 sps:$4 sm:$0xff]  }
 0x107   :  { %2127 = vmatpush1.bf16.msra.mxu1 %v5967_v17  ;;  %4355 = vmatprep.subr.bf16.mxu0 %v6080_v33  ;;  %v6059_v17 = vld [vmem:[%s8377_s1 + $0x38c] ss:$48 sps:$4 sm:$0xff]   ;;  %v6096_v33 = vld [vmem:[%s8379_s3 + $0x1c8] ss:$12 sps:$4 sm:$0xff]  }
 0x108   :  { %2128 = vmatprep.subr.bf16.mxu1 %v5975_v18  ;;  %v6086_v18 = vld [vmem:[%s8379_s3 + $0x19c] ss:$12 sps:$4 sm:$0xff]  }
 0x10b   :  { %2129 = vmatpush1.bf16.msra.mxu1 %v5973_v22  ;;  %v6062_v22 = vld [vmem:[%s8377_s1 + $0x3ec] ss:$48 sps:$4 sm:$0xff]  }
 0x10c   :  { %2130 = vmatprep.subr.bf16.mxu1 %v5981_v23  ;;  %v6092_v23 = vld [vmem:[%s8379_s3 + $0x1b4] ss:$12 sps:$4 sm:$0xff]  }
 0x10f   :  { %2131 = vmatpush1.bf16.msra.mxu1 %v5979_v26  ;;  %v6060_v26 = vld [vmem:[%s8377_s1 + $0x3e8] ss:$48 sps:$4 sm:$0xff]  }
 0x110   :  { %2132 = vmatprep.subr.bf16.mxu1 %v5987_v27  ;;  %v6090_v27 = vld [vmem:[%s8379_s3 + $0x1b0] ss:$12 sps:$4 sm:$0xff]  }
 0x113   :  { %2133 = vmatpush1.bf16.msra.mxu1 %v5985_v30  ;;  %v342_v30 = vrot.slane %v7396_v51, %v341_v24  ;;  %v6147_v24 = vld [vmem:[%s8379_s3 + $0x2a4] ss:$12 sps:$4 sm:$0xff]  }
 0x114   :  { %2134 = vmatprep.subr.bf16.mxu1 %v5993_v31  ;;  %v346_v31 = vrot.slane %v7396_v51, %v345_v25  ;;  %v6105_v25 = vld [vmem:[%s8377_s1 + $0x7a8] ss:$48 sps:$4 sm:$0xff]  }
 0x117   :  { %2135 = vmatpush1.bf16.msra.mxu1 %v5991_v35  ;;  %v6068_v35 = vld [vmem:[%s8377_s1 + $0x4ac] ss:$48 sps:$4 sm:$0xff]  }
 0x118   :  { %2136 = vmatprep.subr.bf16.mxu1 %v5999_v36  ;;  %v6104_v36 = vld [vmem:[%s8379_s3 + $0x1e4] ss:$12 sps:$4 sm:$0xff]  }
 0x11b   :  { %2137 = vmatpush1.bf16.msra.mxu1 %v5997_v37 }
 0x11c   :  { %2138 = vmatprep.subr.bf16.mxu1 %v6005_v38 }
 0x11f   :  { %2139 = vmatpush1.bf16.msra.mxu1 %v6003_v39 }
 0x120   :  { %2253 = vmatprep.subr.bf16.mxu1 %v6011_v40 }
 0x122   :  { %2157 = vmatmul.mubr.bf16.vlgmr.msra.gmra.mrb[8].mxu1 %v6789_v34 }
 0x123   :  { %2254 = vmatpush1.bf16.msra.mxu1 %v6009_v41  ;;  %2285 = vmatprep.mubr.bf16.mxu1 %v6557_v20  ;;  %v6035_v20 = vld [vmem:[%s8377_s1 + $0x1ac] ss:$48 sps:$4 sm:$0xff]  }
 0x124   :  { %2255 = vmatprep.subr.bf16.mxu1 %v6017_v42  ;;  %v6102_v42 = vld [vmem:[%s8379_s3 + $0x1e0] ss:$12 sps:$4 sm:$0xff]  }
 0x127   :  { %2256 = vmatpush1.bf16.msra.mxu1 %v6015_v43 }
 0x128   :  { %2257 = vmatprep.subr.bf16.mxu1 %v6023_v44 }
 0x12b   :  { %2258 = vmatpush1.bf16.msra.mxu1 %v6021_v45 }
 0x12c   :  { %2259 = vmatprep.subr.bf16.mxu1 %v6029_v47 }
 0x12f   :  { %2260 = vmatpush1.bf16.msra.mxu1 %v6027_v48 }
 0x130   :  { %2261 = vmatprep.subr.bf16.mxu1 %v6035_v20  ;;  %v6110_v20 = vld [vmem:[%s8379_s3 + $0x1fc] ss:$12 sps:$4 sm:$0xff]  }
 0x133   :  { %2262 = vmatpush1.bf16.msra.mxu1 %v6033_v50  ;;  %v6071_v50 = vld [vmem:[%s8377_s1 + $0x50c] ss:$48 sps:$4 sm:$0xff]  }
 0x134   :  { %2263 = vmatprep.subr.bf16.mxu1 %v6041_v53 }
 0x135   :  { %v1900_v59 = vpop.f32.mrb[0].mxu1 }
 0x136   :  { %v5546_v60 = vadd.f32 %v1900_v59, %v326_v56  ;;  %v1902_v62 = vpop.f32.mrb[1].mxu1  ;;  %v6074_v59 = vld [vmem:[%s8377_s1 + $0x56c] ss:$48 sps:$4 sm:$0xff]  }
 0x137   :  { %v5547_v1 = vadd.f32 %v1902_v62, %v330_v58  ;;  %v1904_v2 = vpop.f32.mrb[2].mxu1  ;;  %2264 = vmatpush1.bf16.msra.mxu1 %v6039_v55  ;;  %v6116_v62 = vld [vmem:[%s8379_s3 + $0x214] ss:$12 sps:$4 sm:$0xff]  }
 0x138   :  { %v5548_v4 = vadd.f32 %v1904_v2, %v326_v56  ;;  %v1906_v5 = vpop.f32.mrb[3].mxu1  ;;  %2265 = vmatprep.subr.bf16.mxu1 %v6047_v57  ;;  %v2339_v8 = vmax.f32 %v5546_v60, 0.0  ;;  %v6069_v56 = vld [vmem:[%s8377_s1 + $0x508] ss:$48 sps:$4 sm:$0xff]  }
 0x139   :  { %v5549_v6 = vadd.f32 %v1906_v5, %v330_v58  ;;  %v2340_v9 = vmax.f32 %v5547_v1, 0.0  ;;  %v6108_v58 = vld [vmem:[%s8379_s3 + $0x1f8] ss:$12 sps:$4 sm:$0xff]   ;;  %v6077_v1 = vld [vmem:[%s8377_s1 + $0x5cc] ss:$48 sps:$4 sm:$0xff]  }
 0x13a   :  { %v2351_v10 = vmax.f32 %v5548_v4, 0.0  ;;  %v6122_v2 = vld [vmem:[%s8379_s3 + $0x22c] ss:$12 sps:$4 sm:$0xff]   ;;  %v6120_v5 = vld [vmem:[%s8379_s3 + $0x228] ss:$12 sps:$4 sm:$0xff]  }
 0x13b   :  { %v2352_v12 = vmax.f32 %v5549_v6, 0.0  ;;  %2266 = vmatpush1.bf16.msra.mxu1 %v6045_v63  ;;  %v6072_v63 = vld [vmem:[%s8377_s1 + $0x568] ss:$48 sps:$4 sm:$0xff]   ;;  %v6083_v6 = vld [vmem:[%s8377_s1 + $0x62c] ss:$48 sps:$4 sm:$0xff]  }
 0x13c   :  { %v7429_v13 = vpack.c.bf16 %v2351_v10, %v2339_v8  ;;  %2267 = vmatprep.subr.bf16.mxu1 %v6053_v0  ;;  %v2072_v37 = vpop.f32.mrb[0].mxu0  ;;  %v6114_v0 = vld [vmem:[%s8379_s3 + $0x210] ss:$12 sps:$4 sm:$0xff]   ;;  %v6075_v4 = vld [vmem:[%s8377_s1 + $0x5c8] ss:$48 sps:$4 sm:$0xff]  }
 0x13d   :  { %v7431_v14 = vpack.c.bf16 %v2352_v12, %v2340_v9  ;;  %v5554_v38 = vadd.f32 %v2072_v37, %v342_v30  ;;  %v2074_v39 = vpop.f32.mrb[1].mxu0  ;;  %v6126_v8 = vld [vmem:[%s8379_s3 + $0x240] ss:$12 sps:$4 sm:$0xff]   ;;  %v6081_v9 = vld [vmem:[%s8377_s1 + $0x628] ss:$48 sps:$4 sm:$0xff]  }
 0x13e   :  { %v5555_v40 = vadd.f32 %v2074_v39, %v346_v31  ;;  %v2076_v41 = vpop.f32.mrb[2].mxu0  ;;  %v6132_v10 = vld [vmem:[%s8379_s3 + $0x25c] ss:$12 sps:$4 sm:$0xff]   ;;  %v6130_v12 = vld [vmem:[%s8379_s3 + $0x258] ss:$12 sps:$4 sm:$0xff]  }
 0x13f   :  { %2268 = vmatpush1.bf16.msra.mxu1 %v6051_v7  ;;  %4344 = vmatprep.mubr.bf16.mxu0 %v7431_v14  ;;  %v2343_v43 = vmax.f32 %v5554_v38, 0.0  ;;  %v5556_v44 = vadd.f32 %v2076_v41, %v342_v30  ;;  %v2078_v45 = vpop.f32.mrb[3].mxu0  ;;  %v6128_v7 = vld [vmem:[%s8379_s3 + $0x244] ss:$12 sps:$4 sm:$0xff]   ;;  %v6125_v37 = vld [vmem:[%s8377_s1 + $0x8cc] ss:$48 sps:$4 sm:$0xff]  }
 0x140   :  { %4345 = vmatmul.mubr.bf16.vlgmr.msra.gmra.mrb[8].mxu0 %v7429_v13  ;;  %2269 = vmatprep.subr.bf16.mxu1 %v6056_v11  ;;  %v2344_v47 = vmax.f32 %v5555_v40, 0.0  ;;  %v5557_v48 = vadd.f32 %v2078_v45, %v346_v31  ;;  %v6089_v11 = vld [vmem:[%s8377_s1 + $0x68c] ss:$48 sps:$4 sm:$0xff]   ;;  %v6150_v30 = vld [vmem:[%s8379_s3 + $0x2b8] ss:$12 sps:$4 sm:$0xff]  }
 0x141   :  { %4356 = vmatpush1.bf16.msra.mxu0 %v6078_v16  ;;  %v2355_v53 = vmax.f32 %v5556_v44, 0.0  ;;  %v6095_v16 = vld [vmem:[%s8377_s1 + $0x6ec] ss:$48 sps:$4 sm:$0xff]   ;;  %v6160_v38 = vld [vmem:[%s8379_s3 + $0x2e8] ss:$12 sps:$4 sm:$0xff]  }
 0x142   :  { %4357 = vmatprep.subr.bf16.mxu0 %v6086_v18  ;;  %v2356_v55 = vmax.f32 %v5557_v48, 0.0  ;;  %v6135_v18 = vld [vmem:[%s8379_s3 + $0x270] ss:$12 sps:$4 sm:$0xff]   ;;  %v6123_v39 = vld [vmem:[%s8377_s1 + $0x8c8] ss:$48 sps:$4 sm:$0xff]  }
 0x143   :  { %2270 = vmatpush1.bf16.msra.mxu1 %v6054_v15  ;;  %v7502_v57 = vpack.c.bf16 %v2355_v53, %v2343_v43  ;;  %v6087_v15 = vld [vmem:[%s8377_s1 + $0x688] ss:$48 sps:$4 sm:$0xff]   ;;  %v6119_v31 = vld [vmem:[%s8377_s1 + $0x86c] ss:$48 sps:$4 sm:$0xff]   ;;  %v6167_v40 = vld [vmem:[%s8379_s3 + $0x304] ss:$12 sps:$4 sm:$0xff]  }
 0x144   :  { %2271 = vmatprep.subr.bf16.mxu1 %v6059_v17  ;;  %v7510_v60 = vpack.c.bf16 %v2356_v55, %v2344_v47  ;;  %v6137_v17 = vld [vmem:[%s8379_s3 + $0x274] ss:$12 sps:$4 sm:$0xff]  }
 0x145   :  { %4358 = vmatpush1.bf16.msra.mxu0 %v6084_v19  ;;  %v6101_v19 = vld [vmem:[%s8377_s1 + $0x74c] ss:$48 sps:$4 sm:$0xff]   ;;  %v6129_v41 = vld [vmem:[%s8379_s3 + $0xc8] ss:$12 sps:$4 sm:$0xff]  }
 0x146   :  { %4359 = vmatprep.subr.bf16.mxu0 %v6092_v23  ;;  %v6107_v23 = vld [vmem:[%s8377_s1 + $0x7ac] ss:$48 sps:$4 sm:$0xff]  }
 0x147   :  { %2272 = vmatpush1.bf16.msra.mxu1 %v6057_v21  ;;  %v6142_v21 = vld [vmem:[%s8379_s3 + $0x28c] ss:$12 sps:$4 sm:$0xff]  }
 0x148   :  { %2273 = vmatprep.subr.bf16.mxu1 %v6062_v22  ;;  %v6140_v22 = vld [vmem:[%s8379_s3 + $0x288] ss:$12 sps:$4 sm:$0xff]  }
 0x149   :  { %4360 = vmatpush1.bf16.msra.mxu0 %v6090_v27  ;;  %v6113_v27 = vld [vmem:[%s8377_s1 + $0x80c] ss:$48 sps:$4 sm:$0xff]  }
 0x14a   :  { %4361 = vmatprep.subr.bf16.mxu0 %v6098_v29  ;;  %v6111_v29 = vld [vmem:[%s8377_s1 + $0x808] ss:$48 sps:$4 sm:$0xff]  }
 0x14b   :  { %2274 = vmatpush1.bf16.msra.mxu1 %v6060_v26  ;;  %v6145_v26 = vld [vmem:[%s8379_s3 + $0x2a0] ss:$12 sps:$4 sm:$0xff]  }
 0x14c   :  { %2275 = vmatprep.subr.bf16.mxu1 %v6065_v28  ;;  %v6152_v28 = vld [vmem:[%s8379_s3 + $0x2bc] ss:$12 sps:$4 sm:$0xff]  }
 0x14d   :  { %4362 = vmatpush1.bf16.msra.mxu0 %v6096_v33  ;;  %v6155_v33 = vld [vmem:[%s8379_s3 + $0x2d0] ss:$12 sps:$4 sm:$0xff]  }
 0x14e   :  { %4363 = vmatprep.subr.bf16.mxu0 %v6104_v36  ;;  %v6162_v36 = vld [vmem:[%s8379_s3 + $0x2ec] ss:$12 sps:$4 sm:$0xff]  }
 0x14f   :  { %2276 = vmatpush1.bf16.msra.mxu1 %v6063_v32  ;;  %v6157_v32 = vld [vmem:[%s8379_s3 + $0x2d4] ss:$12 sps:$4 sm:$0xff]  }
 0x150   :  { %2277 = vmatprep.subr.bf16.mxu1 %v6068_v35  ;;  %v6117_v35 = vld [vmem:[%s8377_s1 + $0x868] ss:$48 sps:$4 sm:$0xff]  }
 0x151   :  { %4364 = vmatpush1.bf16.msra.mxu0 %v6102_v42  ;;  %v6133_v42 = vld [vmem:[%s8379_s3 + $0x8] ss:$12 sps:$4 sm:$0xff]  }
 0x152   :  { %4365 = vmatprep.subr.bf16.mxu0 %v6110_v20 }
 0x153   :  { %2278 = vmatpush1.bf16.msra.mxu1 %v6066_v46 }
 0x154   :  { %2279 = vmatprep.subr.bf16.mxu1 %v6071_v50 }
 0x155   :  { %4366 = vmatpush1.bf16.msra.mxu0 %v6108_v58 }
 0x156   :  { %4367 = vmatprep.subr.bf16.mxu0 %v6116_v62 }
 0x157   :  { %2280 = vmatpush1.bf16.msra.mxu1 %v6069_v56 }
 0x158   :  { %2281 = vmatprep.subr.bf16.mxu1 %v6074_v59 }
 0x159   :  { %4368 = vmatpush1.bf16.msra.mxu0 %v6114_v0 }
 0x15a   :  { %4369 = vmatprep.subr.bf16.mxu0 %v6122_v2 }
 0x15b   :  { %2282 = vmatpush1.bf16.msra.mxu1 %v6072_v63 }
 0x15c   :  { %2283 = vmatprep.subr.bf16.mxu1 %v6077_v1 }
 0x15d   :  { %4370 = vmatpush1.bf16.msra.mxu0 %v6120_v5 }
 0x15e   :  { %4371 = vmatprep.subr.bf16.mxu0 %v6128_v7 }
 0x15f   :  { %2284 = vmatpush1.bf16.msra.mxu1 %v6075_v4 }
 0x160   :  { %2296 = vmatprep.subr.bf16.mxu1 %v6083_v6 }
 0x161   :  { %4372 = vmatpush1.bf16.msra.mxu0 %v6126_v8 }
 0x162   :  { %2286 = vmatmul.mubr.bf16.vlgmr.msra.gmra.mrb[12].mxu1 %v6681_v61  ;;  %4373 = vmatprep.subr.bf16.mxu0 %v6132_v10  ;;  %v6093_v61 = vld [vmem:[%s8377_s1 + $0x6e8] ss:$48 sps:$4 sm:$0xff]  }
 0x163   :  { %2297 = vmatpush1.bf16.msra.mxu1 %v6081_v9  ;;  %2328 = vmatprep.mubr.bf16.mxu1 %v6463_v3  ;;  %v6099_v3 = vld [vmem:[%s8377_s1 + $0x748] ss:$48 sps:$4 sm:$0xff]  }
 0x164   :  { %2298 = vmatprep.subr.bf16.mxu1 %v6089_v11 }
 0x165   :  { %4374 = vmatpush1.bf16.msra.mxu0 %v6130_v12 }
 0x166   :  { %4375 = vmatprep.subr.bf16.mxu0 %v6137_v17 }
 0x167   :  { %2299 = vmatpush1.bf16.msra.mxu1 %v6087_v15 }
 0x168   :  { %2300 = vmatprep.subr.bf16.mxu1 %v6095_v16 }
 0x169   :  { %4376 = vmatpush1.bf16.msra.mxu0 %v6135_v18 }
 0x16a   :  { %4377 = vmatprep.subr.bf16.mxu0 %v6142_v21 }
 0x16b   :  { %2301 = vmatpush1.bf16.msra.mxu1 %v6093_v61 }
 0x16c   :  { %2302 = vmatprep.subr.bf16.mxu1 %v6101_v19 }
 0x16d   :  { %4378 = vmatpush1.bf16.msra.mxu0 %v6140_v22 }
 0x16e   :  { %4379 = vmatprep.subr.bf16.mxu0 %v6147_v24 }
 0x16f   :  { %2303 = vmatpush1.bf16.msra.mxu1 %v6099_v3 }
 0x170   :  { %2304 = vmatprep.subr.bf16.mxu1 %v6107_v23 }
 0x171   :  { %4380 = vmatpush1.bf16.msra.mxu0 %v6145_v26 }
 0x172   :  { %4381 = vmatprep.subr.bf16.mxu0 %v6152_v28 }
 0x173   :  { %2305 = vmatpush1.bf16.msra.mxu1 %v6105_v25 }
 0x174   :  { %2306 = vmatprep.subr.bf16.mxu1 %v6113_v27 }
 0x175   :  { %4382 = vmatpush1.bf16.msra.mxu0 %v6150_v30 }
 0x176   :  { %4383 = vmatprep.subr.bf16.mxu0 %v6157_v32 }
 0x177   :  { %2307 = vmatpush1.bf16.msra.mxu1 %v6111_v29 }
 0x178   :  { %2308 = vmatprep.subr.bf16.mxu1 %v6119_v31 }
 0x179   :  { %4384 = vmatpush1.bf16.msra.mxu0 %v6155_v33 }
 0x17a   :  { %4385 = vmatprep.subr.bf16.mxu0 %v6162_v36 }
 0x17b   :  { %2309 = vmatpush1.bf16.msra.mxu1 %v6117_v35 }
 0x17c   :  { %2310 = vmatprep.subr.bf16.mxu1 %v6125_v37 }
 0x17d   :  { %4386 = vmatpush1.bf16.msra.mxu0 %v6160_v38 }
 0x17e   :  { %4398 = vmatprep.subr.bf16.mxu0 %v6167_v40 }
 0x17f   :  { %2311 = vmatpush1.bf16.msra.mxu1 %v6123_v39 }
 0x180   :  { %10 = vsyncpa [#allocation3], 0  ;;  %5414 = vmatprep.subr.bf16.mxu1 %v6129_v41  ;;  %v6134_v43 = vld [vmem:[%s8379_s3 + $0xe0] ss:$12 sps:$4 sm:$0xff]   ;;  %v6139_v45 = vld [vmem:[%s8379_s3 + $0xf8] ss:$12 sps:$4 sm:$0xff]  }
 0x181   :  { %v6138_v44 = vld [vmem:[%s8379_s3 + $0x20] ss:$12 sps:$4 sm:$0xff]   ;;  %v6143_v46 = vld [vmem:[%s8379_s3 + $0x38] ss:$12 sps:$4 sm:$0xff]   ;;  %v6149_v47 = vld [vmem:[%s8379_s3 + $0x128] ss:$12 sps:$4 sm:$0xff]  }
 0x182   :  { %2329 = vmatmul.mubr.bf16.vlgmr.msra.gmra.mrb[12].mxu1 %v6789_v34  ;;  %v6144_v34 = vld [vmem:[%s8379_s3 + $0x110] ss:$12 sps:$4 sm:$0xff]   ;;  %v7664_v48 = vsub.s32 2, %v7385_v49  ;;  %v6153_v20 = vld [vmem:[%s8379_s3 + $0x68] ss:$12 sps:$4 sm:$0xff]   ;;  %v337_v50 = vsub.s32 3, %v7385_v49 }
 0x183   :  { %5415 = vmatpush3.bf16.msra.mxu1 %v6133_v42  ;;  %4602 = vmatprep.mubr.bf16.mxu1 %v7431_v14  ;;  %v6148_v14 = vld [vmem:[%s8379_s3 + $0x50] ss:$12 sps:$4 sm:$0xff]   ;;  %v6154_v53 = vld [vmem:[%s8379_s3 + $0x140] ss:$12 sps:$4 sm:$0xff]   ;;  %v6159_v59 = vld [vmem:[%s8379_s3 + $0x158] ss:$12 sps:$4 sm:$0xff]  }
 0x184   :  { %5416 = vmatprep.subr.bf16.mxu1 %v6134_v43  ;;  %v334_v55 = vrot.slane %v7396_v51, %v7664_v48  ;;  %v338_v56 = vrot.slane %v7396_v51, %v337_v50  ;;  %v6158_v58 = vld [vmem:[%s8379_s3 + $0x80] ss:$12 sps:$4 sm:$0xff]   ;;  %v6163_v4 = vld [vmem:[%s8379_s3 + $0x98] ss:$12 sps:$4 sm:$0xff]   ;;  %v6164_v6 = vld [vmem:[%s8379_s3 + $0x170] ss:$12 sps:$4 sm:$0xff]  }
 0x185   :  { %v6168_v12 = vld [vmem:[%s8379_s3 + $0xb0] ss:$12 sps:$4 sm:$0xff]   ;;  %v6169_v16 = vld [vmem:[%s8379_s3 + $0x248] ss:$12 sps:$4 sm:$0xff]   ;;  %v6165_v61 = vld [vmem:[%s8379_s3 + $0x300] ss:$12 sps:$4 sm:$0xff]  }
 0x186   :  { %v6172_v18 = vld [vmem:[%s8379_s3 + $0x31c] ss:$12 sps:$4 sm:$0xff]   ;;  %v6174_v21 = vld [vmem:[%s8379_s3 + $0x260] ss:$12 sps:$4 sm:$0xff]   ;;  %v6170_v3 = vld [vmem:[%s8379_s3 + $0x318] ss:$12 sps:$4 sm:$0xff]  }
 0x187   :  { %5417 = vmatpush3.bf16.msra.mxu1 %v6138_v44  ;;  %v6173_v19 = vld [vmem:[%s8379_s3 + $0x188] ss:$12 sps:$4 sm:$0xff]   ;;  %v6178_v23 = vld [vmem:[%s8379_s3 + $0x1a0] ss:$12 sps:$4 sm:$0xff]   ;;  %v6179_v24 = vld [vmem:[%s8379_s3 + $0x278] ss:$12 sps:$4 sm:$0xff]  }
 0x188   :  { %5418 = vmatprep.subr.bf16.mxu1 %v6139_v45  ;;  %v6177_v22 = vld [vmem:[%s8379_s3 + $0x334] ss:$12 sps:$4 sm:$0xff]   ;;  %v6175_v25 = vld [vmem:[%s8379_s3 + $0x330] ss:$12 sps:$4 sm:$0xff]   ;;  %v6182_v26 = vld [vmem:[%s8379_s3 + $0x34c] ss:$12 sps:$4 sm:$0xff]  }
 0x189   :  { %v6183_v27 = vld [vmem:[%s8379_s3 + $0x1b8] ss:$12 sps:$4 sm:$0xff]   ;;  %v6184_v29 = vld [vmem:[%s8379_s3 + $0x290] ss:$12 sps:$4 sm:$0xff]   ;;  %v6180_v31 = vld [vmem:[%s8379_s3 + $0x348] ss:$12 sps:$4 sm:$0xff]  }
 0x18a   :  { %v6187_v32 = vld [vmem:[%s8379_s3 + $0x364] ss:$12 sps:$4 sm:$0xff]   ;;  %v6189_v38 = vld [vmem:[%s8379_s3 + $0x2a8] ss:$12 sps:$4 sm:$0xff]   ;;  %v6185_v41 = vld [vmem:[%s8379_s3 + $0x360] ss:$12 sps:$4 sm:$0xff]  }
 0x18b   :  { %5419 = vmatpush3.bf16.msra.mxu1 %v6143_v46  ;;  %v6188_v35 = vld [vmem:[%s8379_s3 + $0x1d0] ss:$12 sps:$4 sm:$0xff]  }
 0x18c   :  { %5420 = vmatprep.subr.bf16.mxu1 %v6144_v34  ;;  %v6192_v45 = vld [vmem:[%s8379_s3 + $0x37c] ss:$12 sps:$4 sm:$0xff]  }
 0x18f   :  { %5421 = vmatpush3.bf16.msra.mxu1 %v6148_v14  ;;  %v6193_v14 = vld [vmem:[%s8379_s3 + $0x1e8] ss:$12 sps:$4 sm:$0xff]  }
 0x190   :  { %5422 = vmatprep.subr.bf16.mxu1 %v6149_v47 }
 0x193   :  { %5423 = vmatpush3.bf16.msra.mxu1 %v6153_v20  ;;  %v6194_v20 = vld [vmem:[%s8379_s3 + $0x2c0] ss:$12 sps:$4 sm:$0xff]  }
 0x194   :  { %5424 = vmatprep.subr.bf16.mxu1 %v6154_v53 }
 0x195   :  { %v1986_v62 = vpop.f32.mrb[4].mxu1 }
 0x196   :  { %v5550_v63 = vadd.f32 %v1986_v62, %v334_v55  ;;  %v1988_v0 = vpop.f32.mrb[5].mxu1  ;;  %v6198_v62 = vld [vmem:[%s8379_s3 + $0x200] ss:$12 sps:$4 sm:$0xff]  }
 0x197   :  { %v5551_v1 = vadd.f32 %v1988_v0, %v338_v56  ;;  %v1990_v2 = vpop.f32.mrb[6].mxu1  ;;  %5425 = vmatpush3.bf16.msra.mxu1 %v6158_v58  ;;  %v6197_v58 = vld [vmem:[%s8379_s3 + $0x394] ss:$12 sps:$4 sm:$0xff]   ;;  %v6195_v0 = vld [vmem:[%s8379_s3 + $0x390] ss:$12 sps:$4 sm:$0xff]  }
 0x198   :  { %v5552_v51 = vadd.f32 %v1990_v2, %v334_v55  ;;  %v1992_v5 = vpop.f32.mrb[7].mxu1  ;;  %5426 = vmatprep.subr.bf16.mxu1 %v6159_v59  ;;  %v2341_v8 = vmax.f32 %v5550_v63, 0.0  ;;  %v6190_v55 = vld [vmem:[%s8379_s3 + $0x378] ss:$12 sps:$4 sm:$0xff]  }
 0x199   :  { %v5553_v7 = vadd.f32 %v1992_v5, %v338_v56  ;;  %v2342_v10 = vmax.f32 %v5551_v1, 0.0  ;;  %v6199_v63 = vld [vmem:[%s8379_s3 + $0x2d8] ss:$12 sps:$4 sm:$0xff]  }
 0x19a   :  { %v2353_v9 = vmax.f32 %v5552_v51, 0.0  ;;  %v6202_v1 = vld [vmem:[%s8379_s3 + $0x3ac] ss:$12 sps:$4 sm:$0xff]   ;;  %v6200_v51 = vld [vmem:[%s8379_s3 + $0x3a8] ss:$12 sps:$4 sm:$0xff]  }
 0x19b   :  { %v2354_v11 = vmax.f32 %v5553_v7, 0.0  ;;  %5427 = vmatpush3.bf16.msra.mxu1 %v6163_v4  ;;  %v6203_v2 = vld [vmem:[%s8379_s3 + $0x218] ss:$12 sps:$4 sm:$0xff]   ;;  %v6204_v4 = vld [vmem:[%s8379_s3 + $0x2f0] ss:$12 sps:$4 sm:$0xff]  }
 0x19c   :  { %v7693_v15 = vpack.c.bf16 %v2353_v9, %v2341_v8  ;;  %5428 = vmatprep.subr.bf16.mxu1 %v6164_v6  ;;  %v2244_v33 = vpop.f32.mrb[4].mxu0  ;;  %v6207_v5 = vld [vmem:[%s8379_s3 + $0x3c4] ss:$12 sps:$4 sm:$0xff]   ;;  %v6209_v7 = vld [vmem:[%s8379_s3 + $0x3c8] ss:$12 sps:$4 sm:$0xff]  }
 0x19d   :  { %v2366_v17 = vpack.c.bf16 %v2354_v11, %v2342_v10  ;;  %v2246_v37 = vpop.f32.mrb[5].mxu0  ;;  %v6208_v6 = vld [vmem:[%s8379_s3 + $0x230] ss:$12 sps:$4 sm:$0xff]   ;;  %v6205_v8 = vld [vmem:[%s8379_s3 + $0x3c0] ss:$12 sps:$4 sm:$0xff]  }
 0x19e   :  { %v2248_v40 = vpop.f32.mrb[6].mxu0  ;;  %v6212_v9 = vld [vmem:[%s8379_s3 + $0x3dc] ss:$12 sps:$4 sm:$0xff]   ;;  %v6214_v11 = vld [vmem:[%s8379_s3 + $0x3e0] ss:$12 sps:$4 sm:$0xff]  }
 0x19f   :  { %4387 = vmatprep.mubr.bf16.mxu0 %v2366_v17  ;;  %5429 = vmatpush3.bf16.msra.mxu1 %v6168_v12  ;;  %v2250_v44 = vpop.f32.mrb[7].mxu0  ;;  %v6213_v10 = vld [vmem:[%s8379_s3 + $0x308] ss:$12 sps:$4 sm:$0xff]   ;;  %v6210_v12 = vld [vmem:[%s8379_s3 + $0x3d8] ss:$12 sps:$4 sm:$0xff]  }
 0x1a0   :  { %4388 = vmatmul.mubr.bf16.vlgmr.msra.gmra.mrb[8].mxu0 %v7693_v15  ;;  %5436 = vmatprep.subr.bf16.mxu1 %v6169_v16  ;;  %v6217_v16 = vld [vmem:[%s8379_s3 + $0x3f4] ss:$12 sps:$4 sm:$0xff]  }
 0x1a1   :  { %4399 = vmatpush1.bf16.msra.mxu0 %v6165_v61  ;;  %4430 = vmatprep.mubr.bf16.mxu0 %v7510_v60  ;;  %v6219_v61 = vld [vmem:[%s8379_s3 + $0x3f8] ss:$12 sps:$4 sm:$0xff]  }
 0x1a2   :  { %4603 = vmatmul.mubr.bf16.vlgmr.msra.gmra.mrb[16].mxu1 %v7429_v13  ;;  %4400 = vmatprep.subr.bf16.mxu0 %v6172_v18  ;;  %v7728_v13 = vld [vmem:[%s8378_s2 + $0x8] sm:$0xf]  ;;  %v6222_v18 = vld [vmem:[%s8379_s3 + $0x40c] ss:$12 sps:$4 sm:$0xff]  }
 0x1a3   :  { %5437 = vmatpush3.bf16.msra.mxu1 %v6173_v19  ;;  %4643 = vmatprep.mubr.bf16.mxu1 %v2366_v17  ;;  %v358_v28 = vrot.slane %v7728_v13, %v7399_v52  ;;  %v362_v30 = vrot.slane %v7728_v13, %v7405_v54  ;;  %v6218_v17 = vld [vmem:[%s8379_s3 + $0x320] ss:$12 sps:$4 sm:$0xff]   ;;  %v6224_v19 = vld [vmem:[%s8379_s3 + $0x410] ss:$12 sps:$4 sm:$0xff]  }
 0x1a4   :  { %5438 = vmatprep.subr.bf16.mxu1 %v6174_v21  ;;  %v6220_v21 = vld [vmem:[%s8379_s3 + $0x408] ss:$12 sps:$4 sm:$0xff]  }
 0x1a5   :  { %4401 = vmatpush1.bf16.msra.mxu0 %v6170_v3  ;;  %v5562_v36 = vadd.f32 %v2244_v33, %v358_v28  ;;  %v5563_v39 = vadd.f32 %v2246_v37, %v362_v30  ;;  %v5564_v43 = vadd.f32 %v2248_v40, %v358_v28  ;;  %v5565_v34 = vadd.f32 %v2250_v44, %v362_v30  ;;  %v6227_v3 = vld [vmem:[%s8379_s3 + $0x424] ss:$12 sps:$4 sm:$0xff]   ;;  %v6238_v30 = vld [vmem:[%s8379_s3 + $0x380] ss:$12 sps:$4 sm:$0xff]   ;;  %v6240_v37 = vld [vmem:[%s8379_s3 + $0x468] ss:$12 sps:$4 sm:$0xff]  }
 0x1a6   :  { %4402 = vmatprep.subr.bf16.mxu0 %v6177_v22  ;;  %v6228_v22 = vld [vmem:[%s8379_s3 + $0x350] ss:$12 sps:$4 sm:$0xff]   ;;  %v6230_v28 = vld [vmem:[%s8379_s3 + $0x438] ss:$12 sps:$4 sm:$0xff]   ;;  %v6249_v40 = vld [vmem:[%s8379_s3 + $0x548] ss:$12 sps:$4 sm:$0xff]  }
 0x1a7   :  { %5439 = vmatpush3.bf16.msra.mxu1 %v6178_v23  ;;  %v2347_v42 = vmax.f32 %v5562_v36, 0.0  ;;  %v2348_v46 = vmax.f32 %v5563_v39, 0.0  ;;  %v2359_v47 = vmax.f32 %v5564_v43, 0.0  ;;  %v2360_v53 = vmax.f32 %v5565_v34, 0.0  ;;  %v6229_v23 = vld [vmem:[%s8379_s3 + $0x428] ss:$12 sps:$4 sm:$0xff]  }
 0x1a8   :  { %5440 = vmatprep.subr.bf16.mxu1 %v6179_v24  ;;  %v6225_v24 = vld [vmem:[%s8379_s3 + $0x420] ss:$12 sps:$4 sm:$0xff]   ;;  %v6244_v36 = vld [vmem:[%s8379_s3 + $0x470] ss:$12 sps:$4 sm:$0xff]   ;;  %v6253_v43 = vld [vmem:[%s8379_s3 + $0x488] ss:$12 sps:$4 sm:$0xff]  }
 0x1a9   :  { %4403 = vmatpush1.bf16.msra.mxu0 %v6175_v25  ;;  %v7773_v56 = vpack.c.bf16 %v2359_v47, %v2347_v42  ;;  %v7778_v59 = vpack.c.bf16 %v2360_v53, %v2348_v46  ;;  %v6232_v25 = vld [vmem:[%s8379_s3 + $0x43c] ss:$12 sps:$4 sm:$0xff]   ;;  %v6242_v33 = vld [vmem:[%s8379_s3 + $0x46c] ss:$12 sps:$4 sm:$0xff]   ;;  %v6257_v46 = vld [vmem:[%s8379_s3 + $0x4b4] ss:$12 sps:$4 sm:$0xff]  }
 0x1aa   :  { %4404 = vmatprep.subr.bf16.mxu0 %v6182_v26  ;;  %v6233_v26 = vld [vmem:[%s8379_s3 + $0x368] ss:$12 sps:$4 sm:$0xff]   ;;  %v6248_v39 = vld [vmem:[%s8379_s3 + $0x3b0] ss:$12 sps:$4 sm:$0xff]   ;;  %v6254_v44 = vld [vmem:[%s8379_s3 + $0x560] ss:$12 sps:$4 sm:$0xff]  }
 0x1ab   :  { %5441 = vmatpush3.bf16.msra.mxu1 %v6183_v27  ;;  %v6234_v27 = vld [vmem:[%s8379_s3 + $0x440] ss:$12 sps:$4 sm:$0xff]   ;;  %v6252_v42 = vld [vmem:[%s8379_s3 + $0x49c] ss:$12 sps:$4 sm:$0xff]  }
 0x1ac   :  { %5442 = vmatprep.subr.bf16.mxu1 %v6184_v29  ;;  %v6237_v29 = vld [vmem:[%s8379_s3 + $0x454] ss:$12 sps:$4 sm:$0xff]   ;;  %v6262_v47 = vld [vmem:[%s8379_s3 + $0x4cc] ss:$12 sps:$4 sm:$0xff]   ;;  %v6264_v53 = vld [vmem:[%s8379_s3 + $0x590] ss:$12 sps:$4 sm:$0xff]  }
 0x1ad   :  { %4405 = vmatpush1.bf16.msra.mxu0 %v6180_v31  ;;  %v6239_v31 = vld [vmem:[%s8379_s3 + $0x458] ss:$12 sps:$4 sm:$0xff]   ;;  %v6258_v34 = vld [vmem:[%s8379_s3 + $0x4a0] ss:$12 sps:$4 sm:$0xff]  }
 0x1ae   :  { %4406 = vmatprep.subr.bf16.mxu0 %v6187_v32  ;;  %v6235_v32 = vld [vmem:[%s8379_s3 + $0x450] ss:$12 sps:$4 sm:$0xff]  }
 0x1af   :  { %5443 = vmatpush3.bf16.msra.mxu1 %v6188_v35  ;;  %v6243_v35 = vld [vmem:[%s8379_s3 + $0x398] ss:$12 sps:$4 sm:$0xff]  }
 0x1b0   :  { %5444 = vmatprep.subr.bf16.mxu1 %v6189_v38  ;;  %v6247_v38 = vld [vmem:[%s8379_s3 + $0x484] ss:$12 sps:$4 sm:$0xff]  }
 0x1b1   :  { %4407 = vmatpush1.bf16.msra.mxu0 %v6185_v41  ;;  %v6245_v41 = vld [vmem:[%s8379_s3 + $0x480] ss:$12 sps:$4 sm:$0xff]  }
 0x1b2   :  { %4408 = vmatprep.subr.bf16.mxu0 %v6192_v45  ;;  %v6250_v45 = vld [vmem:[%s8379_s3 + $0x498] ss:$12 sps:$4 sm:$0xff]  }
 0x1b3   :  { %5445 = vmatpush3.bf16.msra.mxu1 %v6193_v14  ;;  %v6259_v14 = vld [vmem:[%s8379_s3 + $0x578] ss:$12 sps:$4 sm:$0xff]  }
 0x1b4   :  { %5446 = vmatprep.subr.bf16.mxu1 %v6194_v20  ;;  %v6263_v20 = vld [vmem:[%s8379_s3 + $0x4b8] ss:$12 sps:$4 sm:$0xff]  }
 0x1b5   :  { %4409 = vmatpush1.bf16.msra.mxu0 %v6190_v55  ;;  %v6260_v55 = vld [vmem:[%s8379_s3 + $0x4c8] ss:$12 sps:$4 sm:$0xff]  }
 0x1b6   :  { %4410 = vmatprep.subr.bf16.mxu0 %v6197_v58  ;;  %v6267_v58 = vld [vmem:[%s8379_s3 + $0x4e4] ss:$12 sps:$4 sm:$0xff]  }
 0x1b7   :  { %5447 = vmatpush3.bf16.msra.mxu1 %v6198_v62  ;;  %v6268_v62 = vld [vmem:[%s8379_s3 + $0x4d0] ss:$12 sps:$4 sm:$0xff]  }
 0x1b8   :  { %5448 = vmatprep.subr.bf16.mxu1 %v6199_v63  ;;  %v6269_v63 = vld [vmem:[%s8379_s3 + $0x5a8] ss:$12 sps:$4 sm:$0xff]  }
 0x1b9   :  { %4411 = vmatpush1.bf16.msra.mxu0 %v6195_v0  ;;  %v6265_v0 = vld [vmem:[%s8379_s3 + $0x4e0] ss:$12 sps:$4 sm:$0xff]  }
 0x1ba   :  { %4412 = vmatprep.subr.bf16.mxu0 %v6202_v1  ;;  %v6272_v1 = vld [vmem:[%s8379_s3 + $0x4fc] ss:$12 sps:$4 sm:$0xff]  }
 0x1bb   :  { %5449 = vmatpush3.bf16.msra.mxu1 %v6203_v2  ;;  %v349_v2 = vsub.s32 6, %v7385_v49 }
 0x1bc   :  { %5450 = vmatprep.subr.bf16.mxu1 %v6204_v4  ;;  %v6273_v4 = vld [vmem:[%s8379_s3 + $0x4e8] ss:$12 sps:$4 sm:$0xff]  }
 0x1bd   :  { %4413 = vmatpush1.bf16.msra.mxu0 %v6200_v51  ;;  %v353_v51 = vsub.s32 7, %v7385_v49 }
 0x1be   :  { %4414 = vmatprep.subr.bf16.mxu0 %v6207_v5  ;;  %v6274_v5 = vld [vmem:[%s8379_s3 + $0x5c0] ss:$12 sps:$4 sm:$0xff]  }
 0x1bf   :  { %5451 = vmatpush3.bf16.msra.mxu1 %v6208_v6  ;;  %v6270_v6 = vld [vmem:[%s8379_s3 + $0x4f8] ss:$12 sps:$4 sm:$0xff]  }
 0x1c0   :  { %5458 = vmatprep.subr.bf16.mxu1 %v6209_v7  ;;  %v6438_v7 = vld [vmem:[%s8378_s2] sm:$0xff] }
 0x1c1   :  { %4415 = vmatpush1.bf16.msra.mxu0 %v6205_v8  ;;  %v350_v8 = vrot.slane %v6438_v7, %v349_v2  ;;  %v6319_v2 = vld [vmem:[%s8379_s3 + $0x758] ss:$12 sps:$4 sm:$0xff]  }
 0x1c2   :  { %4644 = vmatmul.mubr.bf16.vlgmr.msra.gmra.mrb[20].mxu1 %v7693_v15  ;;  %4416 = vmatprep.subr.bf16.mxu0 %v6212_v9  ;;  %v6215_v15 = vld [vmem:[%s8379_s3 + $0x3f0] ss:$12 sps:$4 sm:$0xff]   ;;  %v6277_v9 = vld [vmem:[%s8379_s3 + $0x514] ss:$12 sps:$4 sm:$0xff]  }
 0x1c3   :  { %5459 = vmatpush3.bf16.msra.mxu1 %v6213_v10  ;;  %4684 = vmatprep.mubr.bf16.mxu1 %v7510_v60  ;;  %v6223_v60 = vld [vmem:[%s8379_s3 + $0x338] ss:$12 sps:$4 sm:$0xff]   ;;  %v354_v10 = vrot.slane %v6438_v7, %v353_v51  ;;  %v6320_v7 = vld [vmem:[%s8379_s3 + $0x5e8] ss:$12 sps:$4 sm:$0xff]  }
 0x1c4   :  { %5460 = vmatprep.subr.bf16.mxu1 %v6214_v11  ;;  %v6278_v11 = vld [vmem:[%s8379_s3 + $0x500] ss:$12 sps:$4 sm:$0xff]  }
 0x1c5   :  { %4417 = vmatpush1.bf16.msra.mxu0 %v6210_v12  ;;  %v6279_v12 = vld [vmem:[%s8379_s3 + $0x5d8] ss:$12 sps:$4 sm:$0xff]  }
 0x1c6   :  { %4418 = vmatprep.subr.bf16.mxu0 %v6217_v16  ;;  %v6322_v51 = vld [vmem:[%s8379_s3 + $0x5ec] ss:$12 sps:$4 sm:$0xff]  }
 0x1c7   :  { %5461 = vmatpush3.bf16.msra.mxu1 %v6218_v17  ;;  %v6275_v17 = vld [vmem:[%s8379_s3 + $0x510] ss:$12 sps:$4 sm:$0xff]  }
 0x1c8   :  { %5462 = vmatprep.subr.bf16.mxu1 %v6219_v61 }
 0x1c9   :  { %4419 = vmatpush1.bf16.msra.mxu0 %v6215_v15 }
 0x1ca   :  { %4420 = vmatprep.subr.bf16.mxu0 %v6222_v18  ;;  %v6282_v18 = vld [vmem:[%s8379_s3 + $0x52c] ss:$12 sps:$4 sm:$0xff]  }
 0x1cb   :  { %5463 = vmatpush3.bf16.msra.mxu1 %v6223_v60 }
 0x1cc   :  { %5464 = vmatprep.subr.bf16.mxu1 %v6224_v19 }
 0x1cd   :  { %4421 = vmatpush1.bf16.msra.mxu0 %v6220_v21  ;;  %v6283_v21 = vld [vmem:[%s8379_s3 + $0x518] ss:$12 sps:$4 sm:$0xff]  }
 0x1ce   :  { %4422 = vmatprep.subr.bf16.mxu0 %v6227_v3 }
 0x1cf   :  { %5465 = vmatpush3.bf16.msra.mxu1 %v6228_v22 }
 0x1d0   :  { %5466 = vmatprep.subr.bf16.mxu1 %v6229_v23 }
 0x1d1   :  { %4423 = vmatpush1.bf16.msra.mxu0 %v6225_v24  ;;  %v6284_v24 = vld [vmem:[%s8379_s3 + $0x5f0] ss:$12 sps:$4 sm:$0xff]  }
 0x1d2   :  { %4424 = vmatprep.subr.bf16.mxu0 %v6232_v25 }
 0x1d3   :  { %5467 = vmatpush3.bf16.msra.mxu1 %v6233_v26  ;;  %v6280_v26 = vld [vmem:[%s8379_s3 + $0x528] ss:$12 sps:$4 sm:$0xff]  }
 0x1d4   :  { %5468 = vmatprep.subr.bf16.mxu1 %v6234_v27 }
 0x1d5   :  { %4425 = vmatpush1.bf16.msra.mxu0 %v6230_v28  ;;  %v6287_v28 = vld [vmem:[%s8379_s3 + $0x544] ss:$12 sps:$4 sm:$0xff]  }
 0x1d6   :  { %4426 = vmatprep.subr.bf16.mxu0 %v6237_v29 }
 0x1d7   :  { %5469 = vmatpush3.bf16.msra.mxu1 %v6238_v30 }
 0x1d8   :  { %5470 = vmatprep.subr.bf16.mxu1 %v6239_v31  ;;  %v6288_v31 = vld [vmem:[%s8379_s3 + $0x530] ss:$12 sps:$4 sm:$0xff]  }
 0x1d9   :  { %4427 = vmatpush1.bf16.msra.mxu0 %v6235_v32 }
 0x1da   :  { %4428 = vmatprep.subr.bf16.mxu0 %v6242_v33  ;;  %v6289_v33 = vld [vmem:[%s8379_s3 + $0x6c8] ss:$12 sps:$4 sm:$0xff]  }
 0x1db   :  { %5471 = vmatpush3.bf16.msra.mxu1 %v6243_v35 }
 0x1dc   :  { %5472 = vmatprep.subr.bf16.mxu1 %v6244_v36  ;;  %v6285_v36 = vld [vmem:[%s8379_s3 + $0x540] ss:$12 sps:$4 sm:$0xff]  }
 0x1dd   :  { %4429 = vmatpush1.bf16.msra.mxu0 %v6240_v37  ;;  %v6292_v37 = vld [vmem:[%s8379_s3 + $0x55c] ss:$12 sps:$4 sm:$0xff]  }
 0x1de   :  { %4441 = vmatprep.subr.bf16.mxu0 %v6247_v38  ;;  %v6293_v38 = vld [vmem:[%s8379_s3 + $0x608] ss:$12 sps:$4 sm:$0xff]  }
 0x1df   :  { %5473 = vmatpush3.bf16.msra.mxu1 %v6248_v39  ;;  %v6294_v39 = vld [vmem:[%s8379_s3 + $0x6e0] ss:$12 sps:$4 sm:$0xff]  }
 0x1e0   :  { %4431 = vmatmul.mubr.bf16.vlgmr.msra.gmra.mrb[8].mxu0 %v7502_v57  ;;  %5480 = vmatprep.subr.bf16.mxu1 %v6249_v40  ;;  %v6290_v40 = vld [vmem:[%s8379_s3 + $0x558] ss:$12 sps:$4 sm:$0xff]  }
 0x1e1   :  { %4442 = vmatpush1.bf16.msra.mxu0 %v6245_v41  ;;  %v6297_v41 = vld [vmem:[%s8379_s3 + $0x574] ss:$12 sps:$4 sm:$0xff]  }
 0x1e2   :  { %4685 = vmatmul.mubr.bf16.vlgmr.msra.gmra.mrb[24].mxu1 %v7502_v57  ;;  %4443 = vmatprep.subr.bf16.mxu0 %v6252_v42  ;;  %v6255_v57 = vld [vmem:[%s8379_s3 + $0x4b0] ss:$12 sps:$4 sm:$0xff]   ;;  %v6298_v42 = vld [vmem:[%s8379_s3 + $0x620] ss:$12 sps:$4 sm:$0xff]  }
 0x1e3   :  { %5481 = vmatpush3.bf16.msra.mxu1 %v6253_v43  ;;  %v6299_v43 = vld [vmem:[%s8379_s3 + $0x6f8] ss:$12 sps:$4 sm:$0xff]  }
 0x1e4   :  { %5482 = vmatprep.subr.bf16.mxu1 %v6254_v44  ;;  %v6295_v44 = vld [vmem:[%s8379_s3 + $0x570] ss:$12 sps:$4 sm:$0xff]  }
 0x1e5   :  { %4444 = vmatpush1.bf16.msra.mxu0 %v6250_v45  ;;  %v6302_v45 = vld [vmem:[%s8379_s3 + $0x58c] ss:$12 sps:$4 sm:$0xff]  }
 0x1e6   :  { %4445 = vmatprep.subr.bf16.mxu0 %v6257_v46  ;;  %v6303_v46 = vld [vmem:[%s8379_s3 + $0x638] ss:$12 sps:$4 sm:$0xff]  }
 0x1e7   :  { %5483 = vmatpush3.bf16.msra.mxu1 %v6258_v34  ;;  %v6304_v34 = vld [vmem:[%s8379_s3 + $0x710] ss:$12 sps:$4 sm:$0xff]  }
 0x1e8   :  { %5484 = vmatprep.subr.bf16.mxu1 %v6259_v14  ;;  %v6300_v14 = vld [vmem:[%s8379_s3 + $0x588] ss:$12 sps:$4 sm:$0xff]  }
 0x1e9   :  { %4446 = vmatpush1.bf16.msra.mxu0 %v6255_v57  ;;  %v6307_v57 = vld [vmem:[%s8379_s3 + $0x5a4] ss:$12 sps:$4 sm:$0xff]  }
 0x1ea   :  { %4447 = vmatprep.subr.bf16.mxu0 %v6262_v47  ;;  %v6308_v47 = vld [vmem:[%s8379_s3 + $0x650] ss:$12 sps:$4 sm:$0xff]  }
 0x1eb   :  { %5485 = vmatpush3.bf16.msra.mxu1 %v6263_v20  ;;  %v6309_v20 = vld [vmem:[%s8379_s3 + $0x728] ss:$12 sps:$4 sm:$0xff]  }
 0x1ec   :  { %5486 = vmatprep.subr.bf16.mxu1 %v6264_v53  ;;  %v6305_v53 = vld [vmem:[%s8379_s3 + $0x5a0] ss:$12 sps:$4 sm:$0xff]  }
 0x1ed   :  { %4448 = vmatpush1.bf16.msra.mxu0 %v6260_v55  ;;  %v6312_v55 = vld [vmem:[%s8379_s3 + $0x5bc] ss:$12 sps:$4 sm:$0xff]  }
 0x1ee   :  { %4449 = vmatprep.subr.bf16.mxu0 %v6267_v58  ;;  %v6313_v58 = vld [vmem:[%s8379_s3 + $0x668] ss:$12 sps:$4 sm:$0xff]  }
 0x1ef   :  { %5487 = vmatpush3.bf16.msra.mxu1 %v6268_v62  ;;  %v6314_v62 = vld [vmem:[%s8379_s3 + $0x740] ss:$12 sps:$4 sm:$0xff]  }
 0x1f0   :  { %5488 = vmatprep.subr.bf16.mxu1 %v6269_v63  ;;  %v6310_v63 = vld [vmem:[%s8379_s3 + $0x5b8] ss:$12 sps:$4 sm:$0xff]  }
 0x1f1   :  { %4450 = vmatpush1.bf16.msra.mxu0 %v6265_v0  ;;  %v6317_v0 = vld [vmem:[%s8379_s3 + $0x5d4] ss:$12 sps:$4 sm:$0xff]  }
 0x1f2   :  { %4451 = vmatprep.subr.bf16.mxu0 %v6272_v1  ;;  %v6318_v1 = vld [vmem:[%s8379_s3 + $0x680] ss:$12 sps:$4 sm:$0xff]  }
 0x1f3   :  { %5489 = vmatpush3.bf16.msra.mxu1 %v6273_v4  ;;  %v6315_v4 = vld [vmem:[%s8379_s3 + $0x5d0] ss:$12 sps:$4 sm:$0xff]  }
 0x1f4   :  { %5490 = vmatprep.subr.bf16.mxu1 %v6274_v5  ;;  %v6323_v5 = vld [vmem:[%s8379_s3 + $0x698] ss:$12 sps:$4 sm:$0xff]  }
 0x1f5   :  { %4452 = vmatpush1.bf16.msra.mxu0 %v6270_v6  ;;  %v2158_v16 = vpop.f32.mrb[8].mxu1  ;;  %v6324_v6 = vld [vmem:[%s8379_s3 + $0x770] ss:$12 sps:$4 sm:$0xff]  }
 0x1f6   :  { %v5558_v61 = vadd.f32 %v2158_v16, %v350_v8  ;;  %v2160_v15 = vpop.f32.mrb[9].mxu1  ;;  %4453 = vmatprep.subr.bf16.mxu0 %v6277_v9  ;;  %v6328_v9 = vld [vmem:[%s8379_s3 + $0x6b0] ss:$12 sps:$4 sm:$0xff]   ;;  %v6354_v16 = vld [vmem:[%s8379_s3 + $0x788] ss:$12 sps:$4 sm:$0xff]  }
 0x1f7   :  { %v5559_v60 = vadd.f32 %v2160_v15, %v354_v10  ;;  %v2162_v19 = vpop.f32.mrb[10].mxu1  ;;  %5491 = vmatpush3.bf16.msra.mxu1 %v6278_v11  ;;  %v6325_v11 = vld [vmem:[%s8379_s3 + $0x600] ss:$12 sps:$4 sm:$0xff]  }
 0x1f8   :  { %v2345_v3 = vmax.f32 %v5558_v61, 0.0  ;;  %v5560_v22 = vadd.f32 %v2162_v19, %v350_v8  ;;  %v2164_v23 = vpop.f32.mrb[11].mxu1  ;;  %5492 = vmatprep.subr.bf16.mxu1 %v6279_v12  ;;  %v6327_v8 = vld [vmem:[%s8379_s3 + $0x604] ss:$12 sps:$4 sm:$0xff]   ;;  %v6331_v12 = vld [vmem:[%s8379_s3 + $0x61c] ss:$12 sps:$4 sm:$0xff]  }
 0x1f9   :  { %v5561_v25 = vadd.f32 %v2164_v23, %v354_v10  ;;  %4454 = vmatpush1.bf16.msra.mxu0 %v6275_v17  ;;  %v2346_v29 = vmax.f32 %v5559_v60, 0.0  ;;  %v6353_v10 = vld [vmem:[%s8379_s3 + $0x848] ss:$12 sps:$4 sm:$0xff]   ;;  %v6358_v17 = vld [vmem:[%s8379_s3 + $0x860] ss:$12 sps:$4 sm:$0xff]  }
 0x1fa   :  { %v2357_v27 = vmax.f32 %v5560_v22, 0.0  ;;  %4455 = vmatprep.subr.bf16.mxu0 %v6282_v18  ;;  %v6329_v61 = vld [vmem:[%s8379_s3 + $0x618] ss:$12 sps:$4 sm:$0xff]   ;;  %v6334_v15 = vld [vmem:[%s8379_s3 + $0x634] ss:$12 sps:$4 sm:$0xff]  }
 0x1fb   :  { %v2358_v30 = vmax.f32 %v5561_v25, 0.0  ;;  %5493 = vmatpush3.bf16.msra.mxu1 %v6283_v21  ;;  %v6359_v18 = vld [vmem:[%s8379_s3 + $0x7a0] ss:$12 sps:$4 sm:$0xff]   ;;  %v6332_v60 = vld [vmem:[%s8379_s3 + $0x630] ss:$12 sps:$4 sm:$0xff]  }
 0x1fc   :  { %v8008_v32 = vpack.c.bf16 %v2357_v27, %v2345_v3  ;;  %5494 = vmatprep.subr.bf16.mxu1 %v6284_v24  ;;  %v6337_v19 = vld [vmem:[%s8379_s3 + $0x64c] ss:$12 sps:$4 sm:$0xff]   ;;  %v6368_v3 = vld [vmem:[%s8379_s3 + $0x890] ss:$12 sps:$4 sm:$0xff]   ;;  %v6335_v22 = vld [vmem:[%s8379_s3 + $0x648] ss:$12 sps:$4 sm:$0xff]  }
 0x1fd   :  { %v2370_v35 = vpack.c.bf16 %v2358_v30, %v2346_v29  ;;  %4456 = vmatpush1.bf16.msra.mxu0 %v6280_v26  ;;  %v6364_v21 = vld [vmem:[%s8379_s3 + $0x7b8] ss:$12 sps:$4 sm:$0xff]   ;;  %v6369_v24 = vld [vmem:[%s8379_s3 + $0x7d0] ss:$12 sps:$4 sm:$0xff]   ;;  %v6373_v25 = vld [vmem:[%s8379_s3 + $0x8a8] ss:$12 sps:$4 sm:$0xff]  }
 0x1fe   :  { %4457 = vmatprep.subr.bf16.mxu0 %v6287_v28  ;;  %v6340_v23 = vld [vmem:[%s8379_s3 + $0x664] ss:$12 sps:$4 sm:$0xff]   ;;  %v6338_v26 = vld [vmem:[%s8379_s3 + $0x660] ss:$12 sps:$4 sm:$0xff]   ;;  %v6343_v27 = vld [vmem:[%s8379_s3 + $0x67c] ss:$12 sps:$4 sm:$0xff]  }
 0x1ff   :  { %4473 = vmatprep.mubr.bf16.mxu0 %v2370_v35  ;;  %5495 = vmatpush3.bf16.msra.mxu1 %v6288_v31  ;;  %v6374_v28 = vld [vmem:[%s8379_s3 + $0x7e8] ss:$12 sps:$4 sm:$0xff]   ;;  %v6378_v29 = vld [vmem:[%s8379_s3 + $0x8c0] ss:$12 sps:$4 sm:$0xff]   ;;  %v6341_v30 = vld [vmem:[%s8379_s3 + $0x678] ss:$12 sps:$4 sm:$0xff]  }
 0x200   :  { %4725 = vmatprep.mubr.bf16.mxu1 %v2370_v35  ;;  %5502 = vmatprep.subr.bf16.mxu1 %v6289_v33  ;;  %v6346_v31 = vld [vmem:[%s8379_s3 + $0x694] ss:$12 sps:$4 sm:$0xff]   ;;  %v6383_v33 = vld [vmem:[%s8379_s3 + $0x8d8] ss:$12 sps:$4 sm:$0xff]   ;;  %v6344_v35 = vld [vmem:[%s8379_s3 + $0x690] ss:$12 sps:$4 sm:$0xff]  }
 0x201   :  { %4458 = vmatpush1.bf16.msra.mxu0 %v6285_v36  ;;  %v6349_v36 = vld [vmem:[%s8379_s3 + $0x6ac] ss:$12 sps:$4 sm:$0xff]  }
 0x202   :  { %4726 = vmatmul.mubr.bf16.vlgmr.msra.gmra.mrb[28].mxu1 %v8008_v32  ;;  %4459 = vmatprep.subr.bf16.mxu0 %v6292_v37  ;;  %v6384_v37 = vld [vmem:[%s8379_s3 + $0x818] ss:$12 sps:$4 sm:$0xff]  }
 0x203   :  { %5503 = vmatpush3.bf16.msra.mxu1 %v6293_v38  ;;  %4766 = vmatprep.mubr.bf16.mxu1 %v7778_v59  ;;  %v6388_v38 = vld [vmem:[%s8379_s3 + $0x8f0] ss:$12 sps:$4 sm:$0xff]  }
 0x204   :  { %5504 = vmatprep.subr.bf16.mxu1 %v6294_v39  ;;  %v6347_v39 = vld [vmem:[%s8379_s3 + $0x6a8] ss:$12 sps:$4 sm:$0xff]  }
 0x205   :  { %4460 = vmatpush1.bf16.msra.mxu0 %v6290_v40  ;;  %v6352_v40 = vld [vmem:[%s8379_s3 + $0x6c4] ss:$12 sps:$4 sm:$0xff]  }
 0x206   :  { %4461 = vmatprep.subr.bf16.mxu0 %v6297_v41  ;;  %v6389_v41 = vld [vmem:[%s8379_s3 + $0x830] ss:$12 sps:$4 sm:$0xff]  }
 0x207   :  { %5505 = vmatpush3.bf16.msra.mxu1 %v6298_v42  ;;  %v6350_v42 = vld [vmem:[%s8379_s3 + $0x6c0] ss:$12 sps:$4 sm:$0xff]  }
 0x208   :  { %5506 = vmatprep.subr.bf16.mxu1 %v6299_v43  ;;  %v6357_v43 = vld [vmem:[%s8379_s3 + $0x6dc] ss:$12 sps:$4 sm:$0xff]  }
 0x209   :  { %4462 = vmatpush1.bf16.msra.mxu0 %v6295_v44  ;;  %v6355_v44 = vld [vmem:[%s8379_s3 + $0x6d8] ss:$12 sps:$4 sm:$0xff]  }
 0x20a   :  { %4463 = vmatprep.subr.bf16.mxu0 %v6302_v45  ;;  %v6362_v45 = vld [vmem:[%s8379_s3 + $0x6f4] ss:$12 sps:$4 sm:$0xff]  }
 0x20b   :  { %5507 = vmatpush3.bf16.msra.mxu1 %v6303_v46  ;;  %v6360_v46 = vld [vmem:[%s8379_s3 + $0x6f0] ss:$12 sps:$4 sm:$0xff]  }
 0x20c   :  { %5508 = vmatprep.subr.bf16.mxu1 %v6304_v34  ;;  %v6367_v34 = vld [vmem:[%s8379_s3 + $0x70c] ss:$12 sps:$4 sm:$0xff]  }
 0x20d   :  { %4464 = vmatpush1.bf16.msra.mxu0 %v6300_v14  ;;  %v6365_v14 = vld [vmem:[%s8379_s3 + $0x708] ss:$12 sps:$4 sm:$0xff]  }
 0x20e   :  { %4465 = vmatprep.subr.bf16.mxu0 %v6307_v57  ;;  %v6372_v57 = vld [vmem:[%s8379_s3 + $0x724] ss:$12 sps:$4 sm:$0xff]  }
 0x20f   :  { %5509 = vmatpush3.bf16.msra.mxu1 %v6308_v47  ;;  %v6370_v47 = vld [vmem:[%s8379_s3 + $0x720] ss:$12 sps:$4 sm:$0xff]  }
 0x210   :  { %5510 = vmatprep.subr.bf16.mxu1 %v6309_v20  ;;  %v6377_v20 = vld [vmem:[%s8379_s3 + $0x73c] ss:$12 sps:$4 sm:$0xff]  }
 0x211   :  { %4466 = vmatpush1.bf16.msra.mxu0 %v6305_v53  ;;  %v6375_v53 = vld [vmem:[%s8379_s3 + $0x738] ss:$12 sps:$4 sm:$0xff]  }
 0x212   :  { %4467 = vmatprep.subr.bf16.mxu0 %v6312_v55  ;;  %v366_v55 = vrot.slane %v7728_v13, %v7664_v48 }
 0x213   :  { %5511 = vmatpush3.bf16.msra.mxu1 %v6313_v58  ;;  %v6382_v58 = vld [vmem:[%s8379_s3 + $0x754] ss:$12 sps:$4 sm:$0xff]  }
 0x214   :  { %5512 = vmatprep.subr.bf16.mxu1 %v6314_v62  ;;  %v370_v62 = vrot.slane %v7728_v13, %v337_v50  ;;  %v6385_v13 = vld [vmem:[%s8379_s3 + $0x768] ss:$12 sps:$4 sm:$0xff]  }
 0x215   :  { %4468 = vmatpush1.bf16.msra.mxu0 %v6310_v63 }
 0x216   :  { %4469 = vmatprep.subr.bf16.mxu0 %v6317_v0  ;;  %v6380_v0 = vld [vmem:[%s8379_s3 + $0x750] ss:$12 sps:$4 sm:$0xff]  }
 0x217   :  { %5513 = vmatpush3.bf16.msra.mxu1 %v6318_v1 }
 0x218   :  { %5514 = vmatprep.subr.bf16.mxu1 %v6319_v2 }
 0x219   :  { %4470 = vmatpush1.bf16.msra.mxu0 %v6315_v4  ;;  %v6387_v4 = vld [vmem:[%s8379_s3 + $0x76c] ss:$12 sps:$4 sm:$0xff]  }
 0x21a   :  { %4471 = vmatprep.subr.bf16.mxu0 %v6322_v51 }
 0x21b   :  { %5515 = vmatpush3.bf16.msra.mxu1 %v6323_v5 }
 0x21c   :  { %5516 = vmatprep.subr.bf16.mxu1 %v6324_v6 }
 0x21d   :  { %4472 = vmatpush1.bf16.msra.mxu0 %v6320_v7 }
 0x21e   :  { %4484 = vmatprep.subr.bf16.mxu0 %v6327_v8 }
 0x21f   :  { %5517 = vmatpush3.bf16.msra.mxu1 %v6328_v9 }
 0x220   :  { %4474 = vmatmul.mubr.bf16.vlgmr.msra.gmra.mrb[8].mxu0 %v8008_v32  ;;  %5524 = vmatprep.subr.bf16.mxu1 %v6353_v10  ;;  %v6379_v32 = vld [vmem:[%s8379_s3 + $0x800] ss:$12 sps:$4 sm:$0xff]   ;;  %v6392_v10 = vld [vmem:[%s8379_s3 + $0x784] ss:$12 sps:$4 sm:$0xff]  }
 0x221   :  { %4485 = vmatpush1.bf16.msra.mxu0 %v6325_v11  ;;  %4516 = vmatprep.mubr.bf16.mxu0 %v7778_v59  ;;  %v6363_v59 = vld [vmem:[%s8379_s3 + $0x878] ss:$12 sps:$4 sm:$0xff]  }
 0x222   :  { %4767 = vmatmul.mubr.bf16.vlgmr.msra.gmra.mrb[32].mxu1 %v7773_v56  ;;  %4486 = vmatprep.subr.bf16.mxu0 %v6331_v12 }
 0x223   :  { %5525 = vmatpush3.bf16.msra.mxu1 %v6354_v16 }
 0x224   :  { %5526 = vmatprep.subr.bf16.mxu1 %v6358_v17  ;;  %v6390_v17 = vld [vmem:[%s8379_s3 + $0x780] ss:$12 sps:$4 sm:$0xff]  }
 0x225   :  { %4487 = vmatpush1.bf16.msra.mxu0 %v6329_v61  ;;  %v6395_v61 = vld [vmem:[%s8379_s3 + $0x79c] ss:$12 sps:$4 sm:$0xff]  }
 0x226   :  { %4488 = vmatprep.subr.bf16.mxu0 %v6334_v15  ;;  %v6393_v15 = vld [vmem:[%s8379_s3 + $0x798] ss:$12 sps:$4 sm:$0xff]  }
 0x227   :  { %5527 = vmatpush3.bf16.msra.mxu1 %v6359_v18  ;;  %v6398_v18 = vld [vmem:[%s8379_s3 + $0x7b4] ss:$12 sps:$4 sm:$0xff]  }
 0x228   :  { %5528 = vmatprep.subr.bf16.mxu1 %v6363_v59  ;;  %v6396_v59 = vld [vmem:[%s8379_s3 + $0x7b0] ss:$12 sps:$4 sm:$0xff]  }
 0x229   :  { %4489 = vmatpush1.bf16.msra.mxu0 %v6332_v60  ;;  %v6399_v60 = vld [vmem:[%s8379_s3 + $0x7c8] ss:$12 sps:$4 sm:$0xff]  }
 0x22a   :  { %4490 = vmatprep.subr.bf16.mxu0 %v6337_v19  ;;  %v6404_v19 = vld [vmem:[%s8379_s3 + $0x7e4] ss:$12 sps:$4 sm:$0xff]  }
 0x22b   :  { %5529 = vmatpush3.bf16.msra.mxu1 %v6364_v21  ;;  %v6402_v21 = vld [vmem:[%s8379_s3 + $0x7e0] ss:$12 sps:$4 sm:$0xff]  }
 0x22c   :  { %5530 = vmatprep.subr.bf16.mxu1 %v6368_v3  ;;  %v6407_v3 = vld [vmem:[%s8379_s3 + $0x7fc] ss:$12 sps:$4 sm:$0xff]  }
 0x22d   :  { %4491 = vmatpush1.bf16.msra.mxu0 %v6335_v22  ;;  %v6405_v22 = vld [vmem:[%s8379_s3 + $0x7f8] ss:$12 sps:$4 sm:$0xff]  }
 0x22e   :  { %4492 = vmatprep.subr.bf16.mxu0 %v6340_v23  ;;  %v6410_v23 = vld [vmem:[%s8379_s3 + $0x814] ss:$12 sps:$4 sm:$0xff]  }
 0x22f   :  { %5531 = vmatpush3.bf16.msra.mxu1 %v6369_v24 }
 0x230   :  { %5532 = vmatprep.subr.bf16.mxu1 %v6373_v25  ;;  %v6408_v25 = vld [vmem:[%s8379_s3 + $0x810] ss:$12 sps:$4 sm:$0xff]  }
 0x231   :  { %4493 = vmatpush1.bf16.msra.mxu0 %v6338_v26 }
 0x232   :  { %4494 = vmatprep.subr.bf16.mxu0 %v6343_v27  ;;  %v6413_v27 = vld [vmem:[%s8379_s3 + $0x82c] ss:$12 sps:$4 sm:$0xff]  }
 0x233   :  { %5533 = vmatpush3.bf16.msra.mxu1 %v6374_v28 }
 0x234   :  { %5534 = vmatprep.subr.bf16.mxu1 %v6378_v29 }
 0x235   :  { %4495 = vmatpush1.bf16.msra.mxu0 %v6341_v30 }
 0x236   :  { %4496 = vmatprep.subr.bf16.mxu0 %v6346_v31 }
 0x237   :  { %5535 = vmatpush3.bf16.msra.mxu1 %v6379_v32  ;;  %v6411_v32 = vld [vmem:[%s8379_s3 + $0x828] ss:$12 sps:$4 sm:$0xff]  }
 0x238   :  { %5536 = vmatprep.subr.bf16.mxu1 %v6383_v33  ;;  %v6416_v33 = vld [vmem:[%s8379_s3 + $0x844] ss:$12 sps:$4 sm:$0xff]  }
 0x239   :  { %4497 = vmatpush1.bf16.msra.mxu0 %v6344_v35  ;;  %v6414_v35 = vld [vmem:[%s8379_s3 + $0x840] ss:$12 sps:$4 sm:$0xff]  }
 0x23a   :  { %4498 = vmatprep.subr.bf16.mxu0 %v6349_v36  ;;  %v6419_v36 = vld [vmem:[%s8379_s3 + $0x85c] ss:$12 sps:$4 sm:$0xff]  }
 0x23b   :  { %5537 = vmatpush3.bf16.msra.mxu1 %v6384_v37  ;;  %v6417_v37 = vld [vmem:[%s8379_s3 + $0x858] ss:$12 sps:$4 sm:$0xff]  }
 0x23c   :  { %5538 = vmatprep.subr.bf16.mxu1 %v6388_v38  ;;  %v6422_v38 = vld [vmem:[%s8379_s3 + $0x874] ss:$12 sps:$4 sm:$0xff]  }
 0x23d   :  { %4499 = vmatpush1.bf16.msra.mxu0 %v6347_v39  ;;  %v6420_v39 = vld [vmem:[%s8379_s3 + $0x870] ss:$12 sps:$4 sm:$0xff]  }
 0x23e   :  { %4500 = vmatprep.subr.bf16.mxu0 %v6352_v40  ;;  %v6425_v40 = vld [vmem:[%s8379_s3 + $0x88c] ss:$12 sps:$4 sm:$0xff]  }
 0x23f   :  { %5539 = vmatpush3.bf16.msra.mxu1 %v6389_v41  ;;  %v6423_v41 = vld [vmem:[%s8379_s3 + $0x888] ss:$12 sps:$4 sm:$0xff]  }
 0x241   :  { %4501 = vmatpush1.bf16.msra.mxu0 %v6350_v42  ;;  %v6428_v42 = vld [vmem:[%s8379_s3 + $0x8a4] ss:$12 sps:$4 sm:$0xff]  }
 0x242   :  { %4502 = vmatprep.subr.bf16.mxu0 %v6357_v43  ;;  %v6426_v43 = vld [vmem:[%s8379_s3 + $0x8a0] ss:$12 sps:$4 sm:$0xff]  }
 0x245   :  { %4503 = vmatpush1.bf16.msra.mxu0 %v6355_v44  ;;  %v6431_v44 = vld [vmem:[%s8379_s3 + $0x8bc] ss:$12 sps:$4 sm:$0xff]  }
 0x246   :  { %4504 = vmatprep.subr.bf16.mxu0 %v6362_v45  ;;  %v2759_v45 = vld [vmem:[%s8380_s4] sm:$0x7] }
 0x249   :  { %4505 = vmatpush1.bf16.msra.mxu0 %v6360_v46  ;;  %v6429_v46 = vld [vmem:[%s8379_s3 + $0x8b8] ss:$12 sps:$4 sm:$0xff]  }
 0x24a   :  { %4506 = vmatprep.subr.bf16.mxu0 %v6367_v34  ;;  %v6434_v34 = vld [vmem:[%s8379_s3 + $0x8d4] ss:$12 sps:$4 sm:$0xff]  }
 0x24d   :  { %4507 = vmatpush1.bf16.msra.mxu0 %v6365_v14  ;;  %v2772_v14 = vrot.slane %v2759_v45, %v7664_v48 }
 0x24e   :  { %4508 = vmatprep.subr.bf16.mxu0 %v6372_v57 }
 0x251   :  { %4509 = vmatpush1.bf16.msra.mxu0 %v6370_v47  ;;  %v6432_v47 = vld [vmem:[%s8379_s3 + $0x8d0] ss:$12 sps:$4 sm:$0xff]  }
 0x252   :  { %4510 = vmatprep.subr.bf16.mxu0 %v6377_v20 }
 0x255   :  { %4511 = vmatpush1.bf16.msra.mxu0 %v6375_v53  ;;  %v2330_v63 = vpop.f32.mrb[12].mxu1  ;;  %v6437_v53 = vld [vmem:[%s8379_s3 + $0x8ec] ss:$12 sps:$4 sm:$0xff]  }
 0x256   :  { %v5566_v1 = vadd.f32 %v2330_v63, %v366_v55  ;;  %v2332_v2 = vpop.f32.mrb[13].mxu1  ;;  %4512 = vmatprep.subr.bf16.mxu0 %v6382_v58 }
 0x257   :  { %v5567_v51 = vadd.f32 %v2332_v2, %v370_v62  ;;  %v2334_v5 = vpop.f32.mrb[14].mxu1  ;;  %v6435_v2 = vld [vmem:[%s8379_s3 + $0x8e8] ss:$12 sps:$4 sm:$0xff]  }
 0x258   :  { %v2349_v6 = vmax.f32 %v5566_v1, 0.0  ;;  %v5568_v7 = vadd.f32 %v2334_v5, %v366_v55  ;;  %v2336_v49 = vpop.f32.mrb[15].mxu1 }
 0x259   :  { %v2350_v8 = vmax.f32 %v5567_v51, 0.0  ;;  %v5569_v50 = vadd.f32 %v2336_v49, %v370_v62  ;;  %4513 = vmatpush1.bf16.msra.mxu0 %v6380_v0 }
 0x25a   :  { %v2361_v9 = vmax.f32 %v5568_v7, 0.0  ;;  %4514 = vmatprep.subr.bf16.mxu0 %v6387_v4 }
 0x25b   :  { %v2362_v11 = vmax.f32 %v5569_v50, 0.0 }
 0x25c   :  { %v8260_v12 = vpack.c.bf16 %v2361_v9, %v2349_v6 }
 0x25d   :  { %v2374_v16 = vpack.c.bf16 %v2362_v11, %v2350_v8  ;;  %4515 = vmatpush1.bf16.msra.mxu0 %v6385_v13 }
 0x25e   :  { %4527 = vmatprep.subr.bf16.mxu0 %v6392_v10 }
 0x25f   :  { %4807 = vmatprep.mubr.bf16.mxu1 %v2374_v16 }
 0x260   :  { %4517 = vmatmul.mubr.bf16.vlgmr.msra.gmra.mrb[8].mxu0 %v7773_v56  ;;  %4808 = vmatmul.mubr.bf16.vlgmr.msra.gmra.mrb[36].mxu1 %v8260_v12  ;;  %v6401_v56 = vld [vmem:[%s8379_s3 + $0x7cc] ss:$12 sps:$4 sm:$0xff]   ;;  %s6464_s3 = smov [#allocation2]  }
 0x261   :  { %4528 = vmatpush1.bf16.msra.mxu0 %v6390_v17  ;;  %4559 = vmatprep.mubr.bf16.mxu0 %v2374_v16  ;;  %s4827_s26 = sshll.u32 %s6464_s3, 4  ;;  %s4828_s26 = int_to_ptr.vmem [resolvable:$true] %s4827_s26 }
 0x262   :  { %4529 = vmatprep.subr.bf16.mxu0 %v6395_v61  ;;  %s6439_s27 = scalar_lea.vmem %s4828_s26, 768  ;;  %p6444_p1 = scmp.lt.s32.totalorder %s4828_s26, %s4828_s26 }
 0x263   :  { %p6440_p0 = scmp.ne.s32.totalorder %s4828_s26, %s6439_s27  ;;  %p6445_p2 = scmp.lt.s32.totalorder %s6439_s27, %s6439_s27 }
 0x265   :  { %4530 = vmatpush1.bf16.msra.mxu0 %v6393_v15  ;;  %p6446_p3 = por %p6445_p2, %p6444_p1 }
 0x266   :  { %4531 = vmatprep.subr.bf16.mxu0 %v6398_v18 }
 0x267   :  { %p6447_p4 = pnand %p6446_p3, %p6440_p0 }
 0x269   :  { %4532 = vmatpush1.bf16.msra.mxu0 %v6396_v59 }
 0x26a   :  { %4533 = vmatprep.subr.bf16.mxu0 %v6401_v56 }
 0x26d   :  { %4534 = vmatpush1.bf16.msra.mxu0 %v6399_v60 }
 0x26e   :  { %4535 = vmatprep.subr.bf16.mxu0 %v6404_v19 }
 0x271   :  { %4536 = vmatpush1.bf16.msra.mxu0 %v6402_v21 }
 0x272   :  { %4537 = vmatprep.subr.bf16.mxu0 %v6407_v3 }
 0x275   :  { %4538 = vmatpush1.bf16.msra.mxu0 %v6405_v22  ;;  %v5430_v24 = vpop.f32.mrb[16].mxu1 }
 0x276   :  { %v5431_v26 = vpop.f32.mrb[17].mxu1  ;;  %4539 = vmatprep.subr.bf16.mxu0 %v6410_v23 }
 0x277   :  { %v5432_v28 = vadd.f32 %v5431_v26, %v5430_v24  ;;  %v5433_v29 = vpop.f32.mrb[18].mxu1 }
 0x278   :  { %v5434_v30 = vpop.f32.mrb[19].mxu1 }
 0x279   :  { %4540 = vmatpush1.bf16.msra.mxu0 %v6408_v25  ;;  %v5435_v31 = vadd.f32 %v5434_v30, %v5433_v29  ;;  %v4605_v55 = vadd.f32 %v5432_v28, %v2772_v14 }
 0x27a   :  { %4541 = vmatprep.subr.bf16.mxu0 %v6413_v27 }
 0x27b   :  { %v4608_v0 = vadd.f32 %v5435_v31, %v2772_v14  ;;  %v2764_v31 = vrot.slane %v2759_v45, %v7399_v52 }
 0x27d   :  { %4542 = vmatpush1.bf16.msra.mxu0 %v6411_v32  ;;  %v2768_v32 = vrot.slane %v2759_v45, %v7405_v54 }
 0x27e   :  { %4543 = vmatprep.subr.bf16.mxu0 %v6416_v33 }
 0x281   :  { %4544 = vmatpush1.bf16.msra.mxu0 %v6414_v35 }
 0x282   :  { %4545 = vmatprep.subr.bf16.mxu0 %v6419_v36 }
 0x285   :  { %4546 = vmatpush1.bf16.msra.mxu0 %v6417_v37 }
 0x286   :  { %4547 = vmatprep.subr.bf16.mxu0 %v6422_v38 }
 0x289   :  { %4548 = vmatpush1.bf16.msra.mxu0 %v6420_v39 }
 0x28a   :  { %4549 = vmatprep.subr.bf16.mxu0 %v6425_v40 }
 0x28d   :  { %4550 = vmatpush1.bf16.msra.mxu0 %v6423_v41 }
 0x28e   :  { %4551 = vmatprep.subr.bf16.mxu0 %v6428_v42 }
 0x291   :  { %4552 = vmatpush1.bf16.msra.mxu0 %v6426_v43 }
 0x292   :  { %4553 = vmatprep.subr.bf16.mxu0 %v6431_v44 }
 0x295   :  { %4554 = vmatpush1.bf16.msra.mxu0 %v6429_v46  ;;  %v5452_v57 = vpop.f32.mrb[20].mxu1 }
 0x296   :  { %v5453_v20 = vpop.f32.mrb[21].mxu1  ;;  %4555 = vmatprep.subr.bf16.mxu0 %v6434_v34 }
 0x297   :  { %v5454_v58 = vadd.f32 %v5453_v20, %v5452_v57  ;;  %v5455_v62 = vpop.f32.mrb[22].mxu1 }
 0x298   :  { %v5456_v63 = vpop.f32.mrb[23].mxu1 }
 0x299   :  { %v4646_v1 = vadd.f32 %v5454_v58, %v4605_v55  ;;  %4556 = vmatpush1.bf16.msra.mxu0 %v6432_v47  ;;  %v5457_v48 = vadd.f32 %v5456_v63, %v5455_v62 }
 0x29a   :  { %4557 = vmatprep.subr.bf16.mxu0 %v6437_v53 }
 0x29b   :  { %v4649_v4 = vadd.f32 %v5457_v48, %v4608_v0 }
 0x29d   :  { %4558 = vmatpush1.bf16.msra.mxu0 %v6435_v2 }
 0x2a0   :  { %4560 = vmatmul.mubr.bf16.vlgmr.msra.gmra.mrb[8].mxu0 %v8260_v12 }
 0x2b5   :  { %v5474_v51 = vpop.f32.mrb[24].mxu1 }
 0x2b6   :  { %v5475_v5 = vpop.f32.mrb[25].mxu1 }
 0x2b7   :  { %v5476_v6 = vadd.f32 %v5475_v5, %v5474_v51  ;;  %v5477_v7 = vpop.f32.mrb[26].mxu1 }
 0x2b8   :  { %v5478_v49 = vpop.f32.mrb[27].mxu1 }
 0x2b9   :  { %v4687_v8 = vadd.f32 %v5476_v6, %v4646_v1  ;;  %v5479_v50 = vadd.f32 %v5478_v49, %v5477_v7 }
 0x2bb   :  { %v4690_v13 = vadd.f32 %v5479_v50, %v4649_v4 }
 0x2d5   :  { %v5496_v9 = vpop.f32.mrb[28].mxu1 }
 0x2d6   :  { %v5497_v10 = vpop.f32.mrb[29].mxu1 }
 0x2d7   :  { %v5498_v11 = vadd.f32 %v5497_v10, %v5496_v9  ;;  %v5499_v16 = vpop.f32.mrb[30].mxu1 }
 0x2d8   :  { %v5500_v17 = vpop.f32.mrb[31].mxu1 }
 0x2d9   :  { %v4728_v61 = vadd.f32 %v5498_v11, %v4687_v8  ;;  %v5501_v15 = vadd.f32 %v5500_v17, %v5499_v16 }
 0x2db   :  { %v4731_v18 = vadd.f32 %v5501_v15, %v4690_v13 }
 0x2f5   :  { %v5518_v59 = vpop.f32.mrb[32].mxu1 }
 0x2f6   :  { %v5519_v56 = vpop.f32.mrb[33].mxu1 }
 0x2f7   :  { %v5520_v60 = vadd.f32 %v5519_v56, %v5518_v59  ;;  %v5521_v12 = vpop.f32.mrb[34].mxu1 }
 0x2f8   :  { %v5522_v19 = vpop.f32.mrb[35].mxu1 }
 0x2f9   :  { %v4769_v21 = vadd.f32 %v5520_v60, %v4728_v61  ;;  %v5523_v3 = vadd.f32 %v5522_v19, %v5521_v12 }
 0x2fb   :  { %v4772_v22 = vadd.f32 %v5523_v3, %v4731_v18 }
 0x333   :  { %v5540_v23 = vpop.f32.mrb[36].mxu1 }
 0x334   :  { %v5541_v24 = vpop.f32.mrb[37].mxu1 }
 0x335   :  { %v5542_v25 = vadd.f32 %v5541_v24, %v5540_v23  ;;  %v5543_v26 = vpop.f32.mrb[38].mxu1 }
 0x336   :  { %v5544_v27 = vpop.f32.mrb[39].mxu1 }
 0x337   :  { %v4810_v28 = vadd.f32 %v5542_v25, %v4769_v21  ;;  %v5545_v29 = vadd.f32 %v5544_v27, %v5543_v26 }
 0x339   :  { %4818 = vst [vmem:[#allocation2 + $0x10] sm:$0xff] %v4810_v28  ;;  %v4813_v30 = vadd.f32 %v5545_v29, %v4772_v22 }
 0x33b   :  { %4821 = vst [vmem:[#allocation2 + $0x28] sm:$0xff] %v4813_v30 }
 0x373   :  { %v4561_v33 = vpop.f32.mrb[8].mxu0 }
 0x374   :  { %v5570_v35 = vadd.f32 %v4561_v33, %v2764_v31  ;;  %v4563_v36 = vpop.f32.mrb[9].mxu0 }
 0x375   :  { %v5571_v37 = vadd.f32 %v4563_v36, %v2768_v32  ;;  %v4565_v38 = vpop.f32.mrb[10].mxu0 }
 0x376   :  { %4816 = vst [vmem:[#allocation2] sm:$0xff] %v5570_v35  ;;  %v5572_v39 = vadd.f32 %v4565_v38, %v2764_v31  ;;  %v4567_v40 = vpop.f32.mrb[11].mxu0 }
 0x377   :  { %4817 = vst [vmem:[#allocation2 + $0x8] sm:$0xff] %v5571_v37  ;;  %v5573_v41 = vadd.f32 %v4567_v40, %v2768_v32 }
 0x378   :  { %4819 = vst [vmem:[#allocation2 + $0x18] sm:$0xff] %v5572_v39 }
 0x379   :  { %4820 = vst [vmem:[#allocation2 + $0x20] sm:$0xff] %v5573_v41 }
 0x37a   :  { %6450 = shalt.err (!%p6447_p4)
}
 0x37b   :  { %s6451_s30 = scalar_lea.hbm %s8381_s5, 768 }
 0x37c   :  { %p6452_p5 = scmp.ne.s32.totalorder %s8381_s5, %s6451_s30  ;;  %p6455_p6 = scmp.lt.u32.totalorder %s6451_s30, %s8381_s5 }
 0x37e   :  { %p6457_p7 = pnand %p6455_p6, %p6452_p5 }
 0x380   :  { %6460 = shalt.err (!%p6457_p7)
}
 0x381   :  { %s6465_s9 = smov 384   ;;  %s6466_s10 = smov 24  }
 0x382   :  { %4833 = dma.vmem_to_hbm [thread:$0]  %s4828_s26, 768, %s8381_s5, [#allocation3], %s6465_s9, %s6465_s9, %s6466_s10  }
 0x383   :  { %6461 = dma.done.wait [#allocation3], 768  }
 0x384   :  { %6462 = vsyncadd [#allocation3], 4294966528 }
 0x385   :  { %4837 = vsyncpa [#allocation3], 1 }

</bundles_post_ra>
